<compile_context>
chip_gen: v7x
topology: tpu7x:2x2x1
jax: 0.10.0
libtpu: 0.0.40
codegen_flags: <defaults>
</compile_context>

<pallas_src>
import jax
import jax.numpy as jnp
from jax.experimental import pallas as pl
from jax.experimental.pallas import tpu as pltpu

# ---------------- hyperparameters (small, synthetic) ----------------
HIDDEN = 32          # agent_hps['hidden_size']
VOCAB = 10           # agent_hps['vocab_size']
EMB = 16             # agent_hps['emb_size']
MSG_LEN = 5          # agent_hps['message_length']
IN_CH = 3            # vision_hps['input_channels']
IMG = 64
NUM_IMGS = 3
BATCH = 2

C1_OUT, K1 = 16, 4   # conv1: IN_CH -> 16, kernel=stride=4   (64 -> 16)
C2_OUT, K2 = 36, 4   # conv2: 16 -> 36,    kernel=stride=4   (16 -> 4)
S2 = (IMG // K1) // K2               # final spatial size = 4
NPOS = S2 * S2                       # 16 conv2 output positions
PATCH = K2 * K2 * IN_CH * K1 * K1    # 768 patch lanes  (6 x 128, lane-dense)
C1_WIDE = K2 * K2 * C1_OUT           # 256 conv1 output lanes
FEAT = C2_OUT * NPOS                 # 576, matches nn.Linear(576, hidden)

_VMEM = pl.BlockSpec(memory_space=pltpu.MemorySpace.VMEM)


# ============================ in-kernel helpers ============================

def _vision_fc(p_ref, w1_ref, b1_ref, w2_ref, b2_ref, fcw_ref, fcb_ref, y2_s):
    """Fused conv1 -> conv2 -> fc.

    p_ref  : (NPOS*n_img, 768) bf16, rows (pos, img), lanes (kh, kw, cin, k1h, k1w)
    w1_ref : (768, 256) bf16 block-diagonal conv1 weight (one 48x16 block per (kh,kw))
    w2_ref : (256, 36)  bf16
    fcw_ref: (NPOS, 36, HIDDEN) f32
    y2_s   : (NPOS*n_img, 36) f32 scratch
    returns ht : (n_img, HIDDEN) f32
    """
    n16 = y2_s.shape[0]
    n_img = n16 // NPOS

    # conv1 and conv2 as two fat-K, lane-dense GEMMs; y1 never leaves vregs.
    y1 = jnp.maximum(
        jnp.dot(p_ref[...], w1_ref[...], preferred_element_type=jnp.float32)
        + b1_ref[...], 0.0)
    y2 = jnp.maximum(
        jnp.dot(y1.astype(jnp.bfloat16), w2_ref[...],
                preferred_element_type=jnp.float32) + b2_ref[...], 0.0)
    y2_s[...] = y2

    # fc: one dot per spatial position, summed as a balanced tree (no serial
    # accumulator chain).  fc weight columns were pre-permuted at init so this
    # equals the PyTorch NCHW-flatten + Linear.
    parts = [jnp.dot(y2_s[pl.ds(pos * n_img, n_img), :], fcw_ref[pos],
                     preferred_element_type=jnp.float32)
             for pos in range(NPOS)]
    while len(parts) > 1:
        parts = [parts[i] + parts[i + 1] for i in range(0, len(parts), 2)]
    return parts[0] + fcb_ref[...]


def _lstm_step(x_proj, h, c, whh_ref, b_ref):
    """One PyTorch-style LSTM(Cell) step.

    Gate columns were pre-permuted to (i, f, o, g) so a single wide sigmoid
    covers [0:3H] and a single tanh covers [3H:4H].
    x_proj = (input @ W_ih.T) precomputed (embedding folded at init).
    """
    H = h.shape[1]
    gates = (x_proj
             + jnp.dot(h, whh_ref[...], preferred_element_type=jnp.float32)
             + b_ref[...])
    sig = jax.nn.sigmoid(gates[:, :3 * H])
    g_g = jnp.tanh(gates[:, 3 * H:])
    i_g = sig[:, :H]
    f_g = sig[:, H:2 * H]
    o_g = sig[:, 2 * H:3 * H]
    c_new = f_g * c + i_g * g_g
    h_new = o_g * jnp.tanh(c_new)
    return h_new, c_new


def _logspace_stats(logits):
    """argmax index, log-prob(argmax) and entropy of softmax(logits, axis=1).

    Log-space: z = logits - rowmax (so max(z) == 0 exactly),
    log p(argmax) = -logZ, entropy = logZ - sum(p*z).
    """
    z = logits - jnp.max(logits, axis=1, keepdims=True)
    ez = jnp.exp(z)
    se = jnp.sum(ez, axis=1, keepdims=True)
    logz = jnp.log(se)
    iota = jax.lax.broadcasted_iota(jnp.int32, logits.shape, 1)
    arg = jnp.min(jnp.where(z == 0.0, iota, logits.shape[1]), axis=1, keepdims=True)
    ent = logz - jnp.sum(ez * z, axis=1, keepdims=True) * pl.reciprocal(se, approx=True)
    return arg, -logz, ent


# ============================ fused kernels ============================

def _sender_kernel(p_ref, w1_ref, b1_ref, w2_ref, b2_ref, fcw_ref, fcb_ref,
                   sosih_ref, wembih_ref, whh_ref, bdec_ref, wout_ref, bout_ref,
                   msg_ref, lp_ref, ent_ref, y2_s):
    """Vision -> fc -> greedy LSTMCell decode (eval mode), fully fused."""
    B, L = msg_ref.shape
    V = wout_ref.shape[1]

    ht = _vision_fc(p_ref, w1_ref, b1_ref, w2_ref, b2_ref, fcw_ref, fcb_ref, y2_s)
    ct = jnp.zeros_like(ht)
    x_proj = sosih_ref[...]                           # (1, 4H): sos @ W_ih.T, broadcasts

    iota_v = jax.lax.broadcasted_iota(jnp.int32, (B, V), 1)
    lane_t = jax.lax.broadcasted_iota(jnp.int32, (B, L), 1)
    # final column stays 0 -> matches the torch.cat([..., zeros]) padding.
    msg = jnp.zeros((B, L), jnp.int32)
    lp = jnp.zeros((B, L), jnp.float32)
    ent = jnp.zeros((B, L), jnp.float32)

    for t in range(L - 1):                            # fully unrolled (4 steps)
        ht, ct = _lstm_step(x_proj, ht, ct, whh_ref, bdec_ref)
        logits = (jnp.dot(ht, wout_ref[...], preferred_element_type=jnp.float32)
                  + bout_ref[...])
        tok, logp, entr = _logspace_stats(logits)

        sel = lane_t == t
        msg = jnp.where(sel, tok, msg)
        lp = jnp.where(sel, logp, lp)
        ent = jnp.where(sel, entr, ent)

        if t < L - 2:                                 # next-step input projection
            one_hot = (iota_v == tok).astype(jnp.float32)
            x_proj = jnp.dot(one_hot, wembih_ref[...],   # emb @ W_ih.T pre-folded
                             preferred_element_type=jnp.float32)

    msg_ref[...] = msg
    lp_ref[...] = lp
    ent_ref[...] = ent


def _receiver_kernel(p_ref, w1_ref, b1_ref, w2_ref, b2_ref, fcw_ref, fcb_ref,
                     msg_ref, wembih_ref, whh_ref, benc_ref,
                     choice_ref, lp_ref, y2_s):
    """Vision -> fc for all candidate images, message LSTM encode, scoring."""
    B = choice_ref.shape[0]
    L = msg_ref.shape[1]
    H = whh_ref.shape[0]
    V = wembih_ref.shape[0]

    fv = _vision_fc(p_ref, w1_ref, b1_ref, w2_ref, b2_ref, fcw_ref, fcb_ref, y2_s)
    N = fv.shape[0] // B                              # rows ordered (n, b)

    # RnnEncoder: (shared) embedding folded into W_ih; LSTM over full message.
    msg = msg_ref[...]                                # (B, L) int32
    iota_v = jax.lax.broadcasted_iota(jnp.int32, (B, V), 1)
    h = jnp.zeros((B, H), jnp.float32)
    c = jnp.zeros((B, H), jnp.float32)
    for t in range(L):                                # fully unrolled (5 steps)
        one_hot = (iota_v == msg[:, t:t + 1]).astype(jnp.float32)
        x_proj = jnp.dot(one_hot, wembih_ref[...], preferred_element_type=jnp.float32)
        h, c = _lstm_step(x_proj, h, c, whh_ref, benc_ref)

    # scores[b, n] = <feature(img n, batch b), h_enc[b]>; softmax over images.
    lane_n = jax.lax.broadcasted_iota(jnp.int32, (B, N), 1)
    scores = jnp.zeros((B, N), jnp.float32)
    for n in range(N):
        fv_n = fv[n * B:(n + 1) * B, :]               # (B, H), contiguous rows
        s_n = jnp.sum(fv_n * h, axis=1, keepdims=True)
        scores = jnp.where(lane_n == n, s_n, scores)

    choice, logp, _ = _logspace_stats(scores)
    choice_ref[...] = choice                          # (B, 1) int32 argmax
    lp_ref[...] = logp


# ============================ wrappers ============================

def _extract_patches(x_bnchw):
    """(B, N, C, 64, 64) -> (NPOS * N * B, 768) bf16 patch rows.

    Row order (i, j, n, b); lane order (kh, kw, cin, k1h, k1w).  One XLA
    transpose handles both the patch layout and the receiver's (B,N)->(N,B)
    image reorder; emitted in bf16 to halve the HBM->VMEM patch DMA.
    """
    Bn, Nn = x_bnchw.shape[0], x_bnchw.shape[1]
    x = x_bnchw.reshape(Bn, Nn, IN_CH, S2, K2, K1, S2, K2, K1)
    #          dims:    (b,  n,  cin,  i, kh, u,   j, kw, v)
    x = jnp.transpose(x, (3, 6, 1, 0, 4, 7, 2, 5, 8))   # (i, j, n, b, kh, kw, cin, u, v)
    return x.reshape(NPOS * Nn * Bn, PATCH).astype(jnp.bfloat16)


@jax.jit
def sender_forward(tgt_img, p):
    B = tgt_img.shape[0]
    patches = _extract_patches(tgt_img[:, None])      # (NPOS*B, 768), rows (pos, b)
    msg, lp, ent = pl.pallas_call(
        _sender_kernel,
        out_shape=(jax.ShapeDtypeStruct((B, MSG_LEN), jnp.int32),
                   jax.ShapeDtypeStruct((B, MSG_LEN), jnp.float32),
                   jax.ShapeDtypeStruct((B, MSG_LEN), jnp.float32)),
        in_specs=[_VMEM] * 13,
        out_specs=(_VMEM, _VMEM, _VMEM),
        scratch_shapes=[pltpu.VMEM((NPOS * B, C2_OUT), jnp.float32)],
    )(patches, p["w1"], p["b1"], p["w2"], p["b2"], p["fcw"], p["fcb"],
      p["dec_sos_ih"], p["dec_emb_ih"], p["dec_whh"], p["dec_b"],
      p["out_w"], p["out_b"])
    return msg, lp, ent                               # each (B, MSG_LEN)


@jax.jit
def receiver_forward(message, imgs, p):
    B, N = imgs.shape[0], imgs.shape[1]
    patches = _extract_patches(imgs)                  # (NPOS*N*B, 768), rows (pos, n, b)
    choice, lp = pl.pallas_call(
        _receiver_kernel,
        out_shape=(jax.ShapeDtypeStruct((B, 1), jnp.int32),
                   jax.ShapeDtypeStruct((B, 1), jnp.float32)),
        in_specs=[_VMEM] * 11,
        out_specs=(_VMEM, _VMEM),
        scratch_shapes=[pltpu.VMEM((NPOS * N * B, C2_OUT), jnp.float32)],
    )(patches, p["w1"], p["b1"], p["w2"], p["b2"], p["fcw"], p["fcb"],
      message.astype(jnp.int32), p["enc_emb_ih"], p["enc_whh"], p["enc_b"])
    return choice[:, 0], lp[:, 0], None               # entropy is None in receiver


# ============================ parameters ============================

def init_params(key):
    """Raw PyTorch-shaped parameters."""
    ks = jax.random.split(key, 15)
    s = 0.1
    return {
        "emb":     jax.random.normal(ks[0], (VOCAB, EMB), jnp.float32) * s,
        "sos":     jnp.zeros((EMB,), jnp.float32),                    # nn.Parameter(torch.zeros(emb))
        "conv1_w": jax.random.normal(ks[1], (C1_OUT, IN_CH, K1, K1), jnp.float32) * s,
        "conv1_b": jax.random.normal(ks[2], (C1_OUT,), jnp.float32) * s,
        "conv2_w": jax.random.normal(ks[3], (C2_OUT, C1_OUT, K2, K2), jnp.float32) * s,
        "conv2_b": jax.random.normal(ks[4], (C2_OUT,), jnp.float32) * s,
        "fc_w":    jax.random.normal(ks[5], (HIDDEN, FEAT), jnp.float32) * s,
        "fc_b":    jax.random.normal(ks[6], (HIDDEN,), jnp.float32) * s,
        "dec_wih": jax.random.normal(ks[7], (4 * HIDDEN, EMB), jnp.float32) * s,
        "dec_whh": jax.random.normal(ks[8], (4 * HIDDEN, HIDDEN), jnp.float32) * s,
        "dec_b":   jax.random.normal(ks[9], (4 * HIDDEN,), jnp.float32) * s,  # b_ih + b_hh folded
        "out_w":   jax.random.normal(ks[10], (VOCAB, HIDDEN), jnp.float32) * s,
        "out_b":   jax.random.normal(ks[11], (VOCAB,), jnp.float32) * s,
        "enc_wih": jax.random.normal(ks[12], (4 * HIDDEN, EMB), jnp.float32) * s,
        "enc_whh": jax.random.normal(ks[13], (4 * HIDDEN, HIDDEN), jnp.float32) * s,
        "enc_b":   jax.random.normal(ks[14], (4 * HIDDEN,), jnp.float32) * s,
    }


def _ifog(w):
    """Permute PyTorch LSTM gate blocks (i, f, g, o) -> (i, f, o, g) along axis 0."""
    H = w.shape[0] // 4
    return jnp.concatenate([w[:2 * H], w[3 * H:], w[2 * H:3 * H]], axis=0)


def prepare_params(raw):
    """All weight transposes / reshapes / foldings / dtype casts done once at init."""
    f32, bf16 = jnp.float32, jnp.bfloat16
    w1t = raw["conv1_w"].reshape(C1_OUT, IN_CH * K1 * K1).T            # (48, 16)
    return {
        # vision path: bf16 MXU operands, f32 biases / accumulation
        "w1":  jnp.kron(jnp.eye(K2 * K2, dtype=f32), w1t).astype(bf16),        # (768, 256) block-diag
        "b1":  jnp.tile(raw["conv1_b"], K2 * K2).reshape(1, C1_WIDE).astype(f32),
        "w2":  jnp.transpose(raw["conv2_w"], (2, 3, 1, 0)).reshape(C1_WIDE, C2_OUT).astype(bf16),
        "b2":  raw["conv2_b"].reshape(1, C2_OUT).astype(f32),
        # fc weight columns permuted from NCHW-flatten (cout, pos) to (pos, cout, h)
        "fcw": jnp.transpose(raw["fc_w"].reshape(HIDDEN, C2_OUT, NPOS), (2, 1, 0)).astype(f32),
        "fcb": raw["fc_b"].reshape(1, HIDDEN).astype(f32),
        # decoder LSTMCell: gates permuted to (i,f,o,g), embedding folded into W_ih
        "dec_sos_ih": (raw["sos"].reshape(1, EMB) @ _ifog(raw["dec_wih"]).T).astype(f32),  # (1, 4H)
        "dec_emb_ih": (raw["emb"] @ _ifog(raw["dec_wih"]).T).astype(f32),                  # (V, 4H)
        "dec_whh":    _ifog(raw["dec_whh"]).T.astype(f32),                                 # (H, 4H)
        "dec_b":      _ifog(raw["dec_b"]).reshape(1, 4 * HIDDEN).astype(f32),
        "out_w":      raw["out_w"].T.astype(f32),                                          # (H, V)
        "out_b":      raw["out_b"].reshape(1, VOCAB).astype(f32),
        # receiver encoder LSTM, shared embedding folded likewise
        "enc_emb_ih": (raw["emb"] @ _ifog(raw["enc_wih"]).T).astype(f32),
        "enc_whh":    _ifog(raw["enc_whh"]).T.astype(f32),
        "enc_b":      _ifog(raw["enc_b"]).reshape(1, 4 * HIDDEN).astype(f32),
    }


if __name__ == "__main__":
    key = jax.random.PRNGKey(0)
    params = prepare_params(init_params(jax.random.fold_in(key, 7)))
    tgt_img = jax.random.normal(jax.random.fold_in(key, 1),
                                (BATCH, IN_CH, IMG, IMG), jnp.float32)
    imgs = jax.random.normal(jax.random.fold_in(key, 2),
                             (BATCH, NUM_IMGS, IN_CH, IMG, IMG), jnp.float32)

    # sender mode
    message, log_probs, entropy = sender_forward(tgt_img, params)
    # receiver mode (consumes the sender's message)
    choice, r_log_probs, r_entropy = receiver_forward(message, imgs, params)

    jax.block_until_ready((message, log_probs, entropy, choice, r_log_probs))
    assert message.shape == (BATCH, MSG_LEN) and message.dtype == jnp.int32
    assert log_probs.shape == (BATCH, MSG_LEN) and entropy.shape == (BATCH, MSG_LEN)
    assert bool(jnp.all(message[:, -1] == 0))
    assert bool(jnp.all((message >= 0) & (message < VOCAB)))
    assert bool(jnp.all(log_probs <= 0.0)) and bool(jnp.all(entropy >= 0.0))
    assert choice.shape == (BATCH,) and r_log_probs.shape == (BATCH,) and r_entropy is None
    assert bool(jnp.all((choice >= 0) & (choice < NUM_IMGS)))
    assert bool(jnp.all(r_log_probs <= 0.0))
    print("KERNEL_OK")
</pallas_src>

<mosaic_0001>
module attributes {stable_mosaic.version = 11 : i64} {
  func.func @_sender_kernel(%arg0: memref<32x768xbf16, #tpu.memory_space<vmem>>, %arg1: memref<768x256xbf16, #tpu.memory_space<vmem>>, %arg2: memref<1x256xf32, #tpu.memory_space<vmem>>, %arg3: memref<256x36xbf16, #tpu.memory_space<vmem>>, %arg4: memref<1x36xf32, #tpu.memory_space<vmem>>, %arg5: memref<16x36x32xf32, #tpu.memory_space<vmem>>, %arg6: memref<1x32xf32, #tpu.memory_space<vmem>>, %arg7: memref<1x128xf32, #tpu.memory_space<vmem>>, %arg8: memref<10x128xf32, #tpu.memory_space<vmem>>, %arg9: memref<32x128xf32, #tpu.memory_space<vmem>>, %arg10: memref<1x128xf32, #tpu.memory_space<vmem>>, %arg11: memref<32x10xf32, #tpu.memory_space<vmem>>, %arg12: memref<1x10xf32, #tpu.memory_space<vmem>>, %arg13: memref<2x5xi32, #tpu.memory_space<vmem>>, %arg14: memref<2x5xf32, #tpu.memory_space<vmem>>, %arg15: memref<2x5xf32, #tpu.memory_space<vmem>>, %arg16: memref<32x36xf32, #tpu.memory_space<vmem>>) attributes {dimension_semantics = [], scalar_prefetch = 0 : i64, scratch_operands = 1 : i64, tpu.core_type = #tpu.core_type<tc>} {
    %c0 = arith.constant 0 : index
    %c0_0 = arith.constant 0 : index
    %0 = vector.load %arg0[%c0, %c0_0] : memref<32x768xbf16, #tpu.memory_space<vmem>>, vector<32x768xbf16>
    %c0_1 = arith.constant 0 : index
    %c0_2 = arith.constant 0 : index
    %1 = vector.load %arg1[%c0_1, %c0_2] : memref<768x256xbf16, #tpu.memory_space<vmem>>, vector<768x256xbf16>
    %cst = arith.constant dense<0.000000e+00> : vector<32x256xf32>
    %2 = tpu.matmul %0, %1, %cst {dimension_numbers = #tpu.dot_dimension_numbers<[1], [0], [0], [1], [0, 0, 1, 1], [], []>} : vector<32x768xbf16>, vector<768x256xbf16>, vector<32x256xf32> -> vector<32x256xf32>
    %c0_3 = arith.constant 0 : index
    %c0_4 = arith.constant 0 : index
    %3 = vector.load %arg2[%c0_3, %c0_4] : memref<1x256xf32, #tpu.memory_space<vmem>>, vector<1x256xf32>
    %4 = vector.broadcast %3 : vector<1x256xf32> to vector<32x256xf32>
    %5 = arith.addf %2, %4 : vector<32x256xf32>
    %cst_5 = arith.constant 0.000000e+00 : f32
    %6 = vector.broadcast %cst_5 : f32 to vector<32x256xf32>
    %7 = arith.maximumf %5, %6 : vector<32x256xf32>
    %8 = arith.truncf %7 : vector<32x256xf32> to vector<32x256xbf16>
    %c0_6 = arith.constant 0 : index
    %c0_7 = arith.constant 0 : index
    %9 = vector.load %arg3[%c0_6, %c0_7] : memref<256x36xbf16, #tpu.memory_space<vmem>>, vector<256x36xbf16>
    %cst_8 = arith.constant dense<0.000000e+00> : vector<32x36xf32>
    %10 = tpu.matmul %8, %9, %cst_8 {dimension_numbers = #tpu.dot_dimension_numbers<[1], [0], [0], [1], [0, 0, 1, 1], [], []>} : vector<32x256xbf16>, vector<256x36xbf16>, vector<32x36xf32> -> vector<32x36xf32>
    %c0_9 = arith.constant 0 : index
    %c0_10 = arith.constant 0 : index
    %11 = vector.load %arg4[%c0_9, %c0_10] : memref<1x36xf32, #tpu.memory_space<vmem>>, vector<1x36xf32>
    %12 = vector.broadcast %11 : vector<1x36xf32> to vector<32x36xf32>
    %13 = arith.addf %10, %12 : vector<32x36xf32>
    %cst_11 = arith.constant 0.000000e+00 : f32
    %14 = vector.broadcast %cst_11 : f32 to vector<32x36xf32>
    %15 = arith.maximumf %13, %14 : vector<32x36xf32>
    %c0_12 = arith.constant 0 : index
    %c0_13 = arith.constant 0 : index
    %16 = vector.load %arg16[%c0_12, %c0_13] : memref<32x36xf32, #tpu.memory_space<vmem>>, vector<32x36xf32>
    tpu.vector_store %arg16[%c0_12, %c0_13], %15 {strides = array<i32>} : memref<32x36xf32, #tpu.memory_space<vmem>>, vector<32x36xf32>,
    %c0_14 = arith.constant 0 : index
    %c0_15 = arith.constant 0 : index
    %17 = vector.load %arg16[%c0_14, %c0_15] : memref<32x36xf32, #tpu.memory_space<vmem>>, vector<2x36xf32>
    %c0_16 = arith.constant 0 : index
    %c0_17 = arith.constant 0 : index
    %c0_18 = arith.constant 0 : index
    %18 = vector.load %arg5[%c0_16, %c0_17, %c0_18] : memref<16x36x32xf32, #tpu.memory_space<vmem>>, vector<1x36x32xf32>
    %19 = vector.shape_cast %18 : vector<1x36x32xf32> to vector<36x32xf32>
    %cst_19 = arith.constant dense<0.000000e+00> : vector<2x32xf32>
    %20 = tpu.matmul %17, %19, %cst_19 {dimension_numbers = #tpu.dot_dimension_numbers<[1], [0], [0], [1], [0, 0, 1, 1], [], []>} : vector<2x36xf32>, vector<36x32xf32>, vector<2x32xf32> -> vector<2x32xf32>
    %c2 = arith.constant 2 : index
    %c0_20 = arith.constant 0 : index
    %21 = vector.load %arg16[%c2, %c0_20] : memref<32x36xf32, #tpu.memory_space<vmem>>, vector<2x36xf32>
    %c1 = arith.constant 1 : index
    %c0_21 = arith.constant 0 : index
    %c0_22 = arith.constant 0 : index
    %22 = vector.load %arg5[%c1, %c0_21, %c0_22] : memref<16x36x32xf32, #tpu.memory_space<vmem>>, vector<1x36x32xf32>
    %23 = vector.shape_cast %22 : vector<1x36x32xf32> to vector<36x32xf32>
    %cst_23 = arith.constant dense<0.000000e+00> : vector<2x32xf32>
    %24 = tpu.matmul %21, %23, %cst_23 {dimension_numbers = #tpu.dot_dimension_numbers<[1], [0], [0], [1], [0, 0, 1, 1], [], []>} : vector<2x36xf32>, vector<36x32xf32>, vector<2x32xf32> -> vector<2x32xf32>
    %c4 = arith.constant 4 : index
    %c0_24 = arith.constant 0 : index
    %25 = vector.load %arg16[%c4, %c0_24] : memref<32x36xf32, #tpu.memory_space<vmem>>, vector<2x36xf32>
    %c2_25 = arith.constant 2 : index
    %c0_26 = arith.constant 0 : index
    %c0_27 = arith.constant 0 : index
    %26 = vector.load %arg5[%c2_25, %c0_26, %c0_27] : memref<16x36x32xf32, #tpu.memory_space<vmem>>, vector<1x36x32xf32>
    %27 = vector.shape_cast %26 : vector<1x36x32xf32> to vector<36x32xf32>
    %cst_28 = arith.constant dense<0.000000e+00> : vector<2x32xf32>
    %28 = tpu.matmul %25, %27, %cst_28 {dimension_numbers = #tpu.dot_dimension_numbers<[1], [0], [0], [1], [0, 0, 1, 1], [], []>} : vector<2x36xf32>, vector<36x32xf32>, vector<2x32xf32> -> vector<2x32xf32>
    %c6 = arith.constant 6 : index
    %c0_29 = arith.constant 0 : index
    %29 = vector.load %arg16[%c6, %c0_29] : memref<32x36xf32, #tpu.memory_space<vmem>>, vector<2x36xf32>
    %c3 = arith.constant 3 : index
    %c0_30 = arith.constant 0 : index
    %c0_31 = arith.constant 0 : index
    %30 = vector.load %arg5[%c3, %c0_30, %c0_31] : memref<16x36x32xf32, #tpu.memory_space<vmem>>, vector<1x36x32xf32>
    %31 = vector.shape_cast %30 : vector<1x36x32xf32> to vector<36x32xf32>
    %cst_32 = arith.constant dense<0.000000e+00> : vector<2x32xf32>
    %32 = tpu.matmul %29, %31, %cst_32 {dimension_numbers = #tpu.dot_dimension_numbers<[1], [0], [0], [1], [0, 0, 1, 1], [], []>} : vector<2x36xf32>, vector<36x32xf32>, vector<2x32xf32> -> vector<2x32xf32>
    %c8 = arith.constant 8 : index
    %c0_33 = arith.constant 0 : index
    %33 = vector.load %arg16[%c8, %c0_33] : memref<32x36xf32, #tpu.memory_space<vmem>>, vector<2x36xf32>
    %c4_34 = arith.constant 4 : index
    %c0_35 = arith.constant 0 : index
    %c0_36 = arith.constant 0 : index
    %34 = vector.load %arg5[%c4_34, %c0_35, %c0_36] : memref<16x36x32xf32, #tpu.memory_space<vmem>>, vector<1x36x32xf32>
    %35 = vector.shape_cast %34 : vector<1x36x32xf32> to vector<36x32xf32>
    %cst_37 = arith.constant dense<0.000000e+00> : vector<2x32xf32>
    %36 = tpu.matmul %33, %35, %cst_37 {dimension_numbers = #tpu.dot_dimension_numbers<[1], [0], [0], [1], [0, 0, 1, 1], [], []>} : vector<2x36xf32>, vector<36x32xf32>, vector<2x32xf32> -> vector<2x32xf32>
    %c10 = arith.constant 10 : index
    %c0_38 = arith.constant 0 : index
    %37 = vector.load %arg16[%c10, %c0_38] : memref<32x36xf32, #tpu.memory_space<vmem>>, vector<2x36xf32>
    %c5 = arith.constant 5 : index
    %c0_39 = arith.constant 0 : index
    %c0_40 = arith.constant 0 : index
    %38 = vector.load %arg5[%c5, %c0_39, %c0_40] : memref<16x36x32xf32, #tpu.memory_space<vmem>>, vector<1x36x32xf32>
    %39 = vector.shape_cast %38 : vector<1x36x32xf32> to vector<36x32xf32>
    %cst_41 = arith.constant dense<0.000000e+00> : vector<2x32xf32>
    %40 = tpu.matmul %37, %39, %cst_41 {dimension_numbers = #tpu.dot_dimension_numbers<[1], [0], [0], [1], [0, 0, 1, 1], [], []>} : vector<2x36xf32>, vector<36x32xf32>, vector<2x32xf32> -> vector<2x32xf32>
    %c12 = arith.constant 12 : index
    %c0_42 = arith.constant 0 : index
    %41 = vector.load %arg16[%c12, %c0_42] : memref<32x36xf32, #tpu.memory_space<vmem>>, vector<2x36xf32>
    %c6_43 = arith.constant 6 : index
    %c0_44 = arith.constant 0 : index
    %c0_45 = arith.constant 0 : index
    %42 = vector.load %arg5[%c6_43, %c0_44, %c0_45] : memref<16x36x32xf32, #tpu.memory_space<vmem>>, vector<1x36x32xf32>
    %43 = vector.shape_cast %42 : vector<1x36x32xf32> to vector<36x32xf32>
    %cst_46 = arith.constant dense<0.000000e+00> : vector<2x32xf32>
    %44 = tpu.matmul %41, %43, %cst_46 {dimension_numbers = #tpu.dot_dimension_numbers<[1], [0], [0], [1], [0, 0, 1, 1], [], []>} : vector<2x36xf32>, vector<36x32xf32>, vector<2x32xf32> -> vector<2x32xf32>
    %c14 = arith.constant 14 : index
    %c0_47 = arith.constant 0 : index
    %45 = vector.load %arg16[%c14, %c0_47] : memref<32x36xf32, #tpu.memory_space<vmem>>, vector<2x36xf32>
    %c7 = arith.constant 7 : index
    %c0_48 = arith.constant 0 : index
    %c0_49 = arith.constant 0 : index
    %46 = vector.load %arg5[%c7, %c0_48, %c0_49] : memref<16x36x32xf32, #tpu.memory_space<vmem>>, vector<1x36x32xf32>
    %47 = vector.shape_cast %46 : vector<1x36x32xf32> to vector<36x32xf32>
    %cst_50 = arith.constant dense<0.000000e+00> : vector<2x32xf32>
    %48 = tpu.matmul %45, %47, %cst_50 {dimension_numbers = #tpu.dot_dimension_numbers<[1], [0], [0], [1], [0, 0, 1, 1], [], []>} : vector<2x36xf32>, vector<36x32xf32>, vector<2x32xf32> -> vector<2x32xf32>
    %c16 = arith.constant 16 : index
    %c0_51 = arith.constant 0 : index
    %49 = vector.load %arg16[%c16, %c0_51] : memref<32x36xf32, #tpu.memory_space<vmem>>, vector<2x36xf32>
    %c8_52 = arith.constant 8 : index
    %c0_53 = arith.constant 0 : index
    %c0_54 = arith.constant 0 : index
    %50 = vector.load %arg5[%c8_52, %c0_53, %c0_54] : memref<16x36x32xf32, #tpu.memory_space<vmem>>, vector<1x36x32xf32>
    %51 = vector.shape_cast %50 : vector<1x36x32xf32> to vector<36x32xf32>
    %cst_55 = arith.constant dense<0.000000e+00> : vector<2x32xf32>
    %52 = tpu.matmul %49, %51, %cst_55 {dimension_numbers = #tpu.dot_dimension_numbers<[1], [0], [0], [1], [0, 0, 1, 1], [], []>} : vector<2x36xf32>, vector<36x32xf32>, vector<2x32xf32> -> vector<2x32xf32>
    %c18 = arith.constant 18 : index
    %c0_56 = arith.constant 0 : index
    %53 = vector.load %arg16[%c18, %c0_56] : memref<32x36xf32, #tpu.memory_space<vmem>>, vector<2x36xf32>
    %c9 = arith.constant 9 : index
    %c0_57 = arith.constant 0 : index
    %c0_58 = arith.constant 0 : index
    %54 = vector.load %arg5[%c9, %c0_57, %c0_58] : memref<16x36x32xf32, #tpu.memory_space<vmem>>, vector<1x36x32xf32>
    %55 = vector.shape_cast %54 : vector<1x36x32xf32> to vector<36x32xf32>
    %cst_59 = arith.constant dense<0.000000e+00> : vector<2x32xf32>
    %56 = tpu.matmul %53, %55, %cst_59 {dimension_numbers = #tpu.dot_dimension_numbers<[1], [0], [0], [1], [0, 0, 1, 1], [], []>} : vector<2x36xf32>, vector<36x32xf32>, vector<2x32xf32> -> vector<2x32xf32>
    %c20 = arith.constant 20 : index
    %c0_60 = arith.constant 0 : index
    %57 = vector.load %arg16[%c20, %c0_60] : memref<32x36xf32, #tpu.memory_space<vmem>>, vector<2x36xf32>
    %c10_61 = arith.constant 10 : index
    %c0_62 = arith.constant 0 : index
    %c0_63 = arith.constant 0 : index
    %58 = vector.load %arg5[%c10_61, %c0_62, %c0_63] : memref<16x36x32xf32, #tpu.memory_space<vmem>>, vector<1x36x32xf32>
    %59 = vector.shape_cast %58 : vector<1x36x32xf32> to vector<36x32xf32>
    %cst_64 = arith.constant dense<0.000000e+00> : vector<2x32xf32>
    %60 = tpu.matmul %57, %59, %cst_64 {dimension_numbers = #tpu.dot_dimension_numbers<[1], [0], [0], [1], [0, 0, 1, 1], [], []>} : vector<2x36xf32>, vector<36x32xf32>, vector<2x32xf32> -> vector<2x32xf32>
    %c22 = arith.constant 22 : index
    %c0_65 = arith.constant 0 : index
    %61 = vector.load %arg16[%c22, %c0_65] : memref<32x36xf32, #tpu.memory_space<vmem>>, vector<2x36xf32>
    %c11 = arith.constant 11 : index
    %c0_66 = arith.constant 0 : index
    %c0_67 = arith.constant 0 : index
    %62 = vector.load %arg5[%c11, %c0_66, %c0_67] : memref<16x36x32xf32, #tpu.memory_space<vmem>>, vector<1x36x32xf32>
    %63 = vector.shape_cast %62 : vector<1x36x32xf32> to vector<36x32xf32>
    %cst_68 = arith.constant dense<0.000000e+00> : vector<2x32xf32>
    %64 = tpu.matmul %61, %63, %cst_68 {dimension_numbers = #tpu.dot_dimension_numbers<[1], [0], [0], [1], [0, 0, 1, 1], [], []>} : vector<2x36xf32>, vector<36x32xf32>, vector<2x32xf32> -> vector<2x32xf32>
    %c24 = arith.constant 24 : index
    %c0_69 = arith.constant 0 : index
    %65 = vector.load %arg16[%c24, %c0_69] : memref<32x36xf32, #tpu.memory_space<vmem>>, vector<2x36xf32>
    %c12_70 = arith.constant 12 : index
    %c0_71 = arith.constant 0 : index
    %c0_72 = arith.constant 0 : index
    %66 = vector.load %arg5[%c12_70, %c0_71, %c0_72] : memref<16x36x32xf32, #tpu.memory_space<vmem>>, vector<1x36x32xf32>
    %67 = vector.shape_cast %66 : vector<1x36x32xf32> to vector<36x32xf32>
    %cst_73 = arith.constant dense<0.000000e+00> : vector<2x32xf32>
    %68 = tpu.matmul %65, %67, %cst_73 {dimension_numbers = #tpu.dot_dimension_numbers<[1], [0], [0], [1], [0, 0, 1, 1], [], []>} : vector<2x36xf32>, vector<36x32xf32>, vector<2x32xf32> -> vector<2x32xf32>
    %c26 = arith.constant 26 : index
    %c0_74 = arith.constant 0 : index
    %69 = vector.load %arg16[%c26, %c0_74] : memref<32x36xf32, #tpu.memory_space<vmem>>, vector<2x36xf32>
    %c13 = arith.constant 13 : index
    %c0_75 = arith.constant 0 : index
    %c0_76 = arith.constant 0 : index
    %70 = vector.load %arg5[%c13, %c0_75, %c0_76] : memref<16x36x32xf32, #tpu.memory_space<vmem>>, vector<1x36x32xf32>
    %71 = vector.shape_cast %70 : vector<1x36x32xf32> to vector<36x32xf32>
    %cst_77 = arith.constant dense<0.000000e+00> : vector<2x32xf32>
    %72 = tpu.matmul %69, %71, %cst_77 {dimension_numbers = #tpu.dot_dimension_numbers<[1], [0], [0], [1], [0, 0, 1, 1], [], []>} : vector<2x36xf32>, vector<36x32xf32>, vector<2x32xf32> -> vector<2x32xf32>
    %c28 = arith.constant 28 : index
    %c0_78 = arith.constant 0 : index
    %73 = vector.load %arg16[%c28, %c0_78] : memref<32x36xf32, #tpu.memory_space<vmem>>, vector<2x36xf32>
    %c14_79 = arith.constant 14 : index
    %c0_80 = arith.constant 0 : index
    %c0_81 = arith.constant 0 : index
    %74 = vector.load %arg5[%c14_79, %c0_80, %c0_81] : memref<16x36x32xf32, #tpu.memory_space<vmem>>, vector<1x36x32xf32>
    %75 = vector.shape_cast %74 : vector<1x36x32xf32> to vector<36x32xf32>
    %cst_82 = arith.constant dense<0.000000e+00> : vector<2x32xf32>
    %76 = tpu.matmul %73, %75, %cst_82 {dimension_numbers = #tpu.dot_dimension_numbers<[1], [0], [0], [1], [0, 0, 1, 1], [], []>} : vector<2x36xf32>, vector<36x32xf32>, vector<2x32xf32> -> vector<2x32xf32>
    %c30 = arith.constant 30 : index
    %c0_83 = arith.constant 0 : index
    %77 = vector.load %arg16[%c30, %c0_83] : memref<32x36xf32, #tpu.memory_space<vmem>>, vector<2x36xf32>
    %c15 = arith.constant 15 : index
    %c0_84 = arith.constant 0 : index
    %c0_85 = arith.constant 0 : index
    %78 = vector.load %arg5[%c15, %c0_84, %c0_85] : memref<16x36x32xf32, #tpu.memory_space<vmem>>, vector<1x36x32xf32>
    %79 = vector.shape_cast %78 : vector<1x36x32xf32> to vector<36x32xf32>
    %cst_86 = arith.constant dense<0.000000e+00> : vector<2x32xf32>
    %80 = tpu.matmul %77, %79, %cst_86 {dimension_numbers = #tpu.dot_dimension_numbers<[1], [0], [0], [1], [0, 0, 1, 1], [], []>} : vector<2x36xf32>, vector<36x32xf32>, vector<2x32xf32> -> vector<2x32xf32>
    %81 = arith.addf %20, %24 : vector<2x32xf32>
    %82 = arith.addf %28, %32 : vector<2x32xf32>
    %83 = arith.addf %36, %40 : vector<2x32xf32>
    %84 = arith.addf %44, %48 : vector<2x32xf32>
    %85 = arith.addf %52, %56 : vector<2x32xf32>
    %86 = arith.addf %60, %64 : vector<2x32xf32>
    %87 = arith.addf %68, %72 : vector<2x32xf32>
    %88 = arith.addf %76, %80 : vector<2x32xf32>
    %89 = arith.addf %81, %82 : vector<2x32xf32>
    %90 = arith.addf %83, %84 : vector<2x32xf32>
    %91 = arith.addf %85, %86 : vector<2x32xf32>
    %92 = arith.addf %87, %88 : vector<2x32xf32>
    %93 = arith.addf %89, %90 : vector<2x32xf32>
    %94 = arith.addf %91, %92 : vector<2x32xf32>
    %95 = arith.addf %93, %94 : vector<2x32xf32>
    %c0_87 = arith.constant 0 : index
    %c0_88 = arith.constant 0 : index
    %96 = vector.load %arg6[%c0_87, %c0_88] : memref<1x32xf32, #tpu.memory_space<vmem>>, vector<1x32xf32>
    %97 = vector.broadcast %96 : vector<1x32xf32> to vector<2x32xf32>
    %98 = arith.addf %95, %97 : vector<2x32xf32>
    %cst_89 = arith.constant 0.000000e+00 : f32
    %99 = vector.broadcast %cst_89 : f32 to vector<2x32xf32>
    %c0_90 = arith.constant 0 : index
    %c0_91 = arith.constant 0 : index
    %100 = vector.load %arg7[%c0_90, %c0_91] : memref<1x128xf32, #tpu.memory_space<vmem>>, vector<1x128xf32>
    %101 = tpu.iota {dimensions = array<i32: 1>} : vector<2x10xi32>
    %102 = tpu.iota {dimensions = array<i32: 1>} : vector<2x5xi32>
    %c0_i32 = arith.constant 0 : i32
    %103 = vector.broadcast %c0_i32 : i32 to vector<2x5xi32>
    %cst_92 = arith.constant 0.000000e+00 : f32
    %104 = vector.broadcast %cst_92 : f32 to vector<2x5xf32>
    %cst_93 = arith.constant 0.000000e+00 : f32
    %105 = vector.broadcast %cst_93 : f32 to vector<2x5xf32>
    %c0_94 = arith.constant 0 : index
    %c0_95 = arith.constant 0 : index
    %106 = vector.load %arg9[%c0_94, %c0_95] : memref<32x128xf32, #tpu.memory_space<vmem>>, vector<32x128xf32>
    %cst_96 = arith.constant dense<0.000000e+00> : vector<2x128xf32>
    %107 = tpu.matmul %98, %106, %cst_96 {dimension_numbers = #tpu.dot_dimension_numbers<[1], [0], [0], [1], [0, 0, 1, 1], [], []>} : vector<2x32xf32>, vector<32x128xf32>, vector<2x128xf32> -> vector<2x128xf32>
    %108 = vector.broadcast %100 : vector<1x128xf32> to vector<2x128xf32>
    %109 = arith.addf %108, %107 : vector<2x128xf32>
    %c0_97 = arith.constant 0 : index
    %c0_98 = arith.constant 0 : index
    %110 = vector.load %arg10[%c0_97, %c0_98] : memref<1x128xf32, #tpu.memory_space<vmem>>, vector<1x128xf32>
    %111 = vector.broadcast %110 : vector<1x128xf32> to vector<2x128xf32>
    %112 = arith.addf %109, %111 : vector<2x128xf32>
    %113 = vector.extract_strided_slice %112 {offsets = [0, 0], sizes = [2, 96], strides = [1, 1]} : vector<2x128xf32> to vector<2x96xf32>
    %114 = arith.negf %113 : vector<2x96xf32>
    %115 = math.exp %114 : vector<2x96xf32>
    %cst_99 = arith.constant 1.000000e+00 : f32
    %116 = vector.broadcast %cst_99 : f32 to vector<2x96xf32>
    %117 = arith.addf %116, %115 : vector<2x96xf32>
    %118 = arith.divf %116, %117 : vector<2x96xf32>
    %119 = vector.extract_strided_slice %112 {offsets = [0, 96], sizes = [2, 32], strides = [1, 1]} : vector<2x128xf32> to vector<2x32xf32>
    %120 = math.tanh %119 : vector<2x32xf32>
    %121 = vector.extract_strided_slice %118 {offsets = [0, 0], sizes = [2, 32], strides = [1, 1]} : vector<2x96xf32> to vector<2x32xf32>
    %122 = vector.extract_strided_slice %118 {offsets = [0, 32], sizes = [2, 32], strides = [1, 1]} : vector<2x96xf32> to vector<2x32xf32>
    %123 = vector.extract_strided_slice %118 {offsets = [0, 64], sizes = [2, 32], strides = [1, 1]} : vector<2x96xf32> to vector<2x32xf32>
    %124 = arith.mulf %122, %99 : vector<2x32xf32>
    %125 = arith.mulf %121, %120 : vector<2x32xf32>
    %126 = arith.addf %124, %125 : vector<2x32xf32>
    %127 = math.tanh %126 : vector<2x32xf32>
    %128 = arith.mulf %123, %127 : vector<2x32xf32>
    %c0_100 = arith.constant 0 : index
    %c0_101 = arith.constant 0 : index
    %129 = vector.load %arg11[%c0_100, %c0_101] : memref<32x10xf32, #tpu.memory_space<vmem>>, vector<32x10xf32>
    %cst_102 = arith.constant dense<0.000000e+00> : vector<2x10xf32>
    %130 = tpu.matmul %128, %129, %cst_102 {dimension_numbers = #tpu.dot_dimension_numbers<[1], [0], [0], [1], [0, 0, 1, 1], [], []>} : vector<2x32xf32>, vector<32x10xf32>, vector<2x10xf32> -> vector<2x10xf32>
    %c0_103 = arith.constant 0 : index
    %c0_104 = arith.constant 0 : index
    %131 = vector.load %arg12[%c0_103, %c0_104] : memref<1x10xf32, #tpu.memory_space<vmem>>, vector<1x10xf32>
    %132 = vector.broadcast %131 : vector<1x10xf32> to vector<2x10xf32>
    %133 = arith.addf %130, %132 : vector<2x10xf32>
    %cst_105 = arith.constant dense<0xFF800000> : vector<2xf32>
    %134 = vector.multi_reduction <maximumf>, %133, %cst_105 [1] : vector<2x10xf32> to vector<2xf32>
    %135 = vector.shape_cast %134 : vector<2xf32> to vector<2x1xf32>
    %136 = vector.broadcast %135 : vector<2x1xf32> to vector<2x10xf32>
    %137 = arith.subf %133, %136 : vector<2x10xf32>
    %138 = math.exp %137 : vector<2x10xf32>
    %cst_106 = arith.constant dense<0.000000e+00> : vector<2xf32>
    %139 = vector.multi_reduction <add>, %138, %cst_106 [1] : vector<2x10xf32> to vector<2xf32>
    %140 = vector.shape_cast %139 : vector<2xf32> to vector<2x1xf32>
    %141 = math.log %140 : vector<2x1xf32>
    %142 = tpu.iota {dimensions = array<i32: 1>} : vector<2x10xi32>
    %cst_107 = arith.constant 0.000000e+00 : f32
    %143 = vector.broadcast %cst_107 : f32 to vector<2x10xf32>
    %144 = arith.cmpf oeq, %137, %143 : vector<2x10xf32>
    %c10_i32 = arith.constant 10 : i32
    %145 = vector.broadcast %c10_i32 : i32 to vector<2x10xi32>
    %146 = arith.select %144, %142, %145 : vector<2x10xi1>, vector<2x10xi32>
    %cst_108 = arith.constant dense<2147483647> : vector<2xi32>
    %147 = vector.multi_reduction <minsi>, %146, %cst_108 [1] : vector<2x10xi32> to vector<2xi32>
    %148 = vector.shape_cast %147 : vector<2xi32> to vector<2x1xi32>
    %149 = arith.mulf %138, %137 : vector<2x10xf32>
    %cst_109 = arith.constant dense<0.000000e+00> : vector<2xf32>
    %150 = vector.multi_reduction <add>, %149, %cst_109 [1] : vector<2x10xf32> to vector<2xf32>
    %151 = vector.shape_cast %150 : vector<2xf32> to vector<2x1xf32>
    %152 = tpu.reciprocal %140 {approx = true} : vector<2x1xf32> -> vector<2x1xf32>
    %153 = arith.mulf %151, %152 : vector<2x1xf32>
    %154 = arith.subf %141, %153 : vector<2x1xf32>
    %cst_110 = arith.constant 0.000000e+00 : f32
    %155 = vector.broadcast %cst_110 : f32 to vector<2x1xf32>
    %156 = arith.subf %155, %141 : vector<2x1xf32>
    %c0_i32_111 = arith.constant 0 : i32
    %157 = vector.broadcast %c0_i32_111 : i32 to vector<2x5xi32>
    %158 = arith.cmpi eq, %102, %157 : vector<2x5xi32>
    %159 = vector.shape_cast %148 : vector<2x1xi32> to vector<2x1xi32>
    %160 = vector.broadcast %159 : vector<2x1xi32> to vector<2x5xi32>
    %161 = arith.select %158, %160, %103 : vector<2x5xi1>, vector<2x5xi32>
    %162 = vector.shape_cast %156 : vector<2x1xf32> to vector<2x1xf32>
    %163 = vector.broadcast %162 : vector<2x1xf32> to vector<2x5xf32>
    %164 = arith.select %158, %163, %104 : vector<2x5xi1>, vector<2x5xf32>
    %165 = vector.shape_cast %154 : vector<2x1xf32> to vector<2x1xf32>
    %166 = vector.broadcast %165 : vector<2x1xf32> to vector<2x5xf32>
    %167 = arith.select %158, %166, %105 : vector<2x5xi1>, vector<2x5xf32>
    %168 = vector.broadcast %148 : vector<2x1xi32> to vector<2x10xi32>
    %169 = arith.cmpi eq, %101, %168 : vector<2x10xi32>
    %170 = arith.extui %169 : vector<2x10xi1> to vector<2x10xi32>
    %171 = arith.sitofp %170 : vector<2x10xi32> to vector<2x10xf32>
    %c0_112 = arith.constant 0 : index
    %c0_113 = arith.constant 0 : index
    %172 = vector.load %arg8[%c0_112, %c0_113] : memref<10x128xf32, #tpu.memory_space<vmem>>, vector<10x128xf32>
    %cst_114 = arith.constant dense<0.000000e+00> : vector<2x128xf32>
    %173 = tpu.matmul %171, %172, %cst_114 {dimension_numbers = #tpu.dot_dimension_numbers<[1], [0], [0], [1], [0, 0, 1, 1], [], []>} : vector<2x10xf32>, vector<10x128xf32>, vector<2x128xf32> -> vector<2x128xf32>
    %c0_115 = arith.constant 0 : index
    %c0_116 = arith.constant 0 : index
    %174 = vector.load %arg9[%c0_115, %c0_116] : memref<32x128xf32, #tpu.memory_space<vmem>>, vector<32x128xf32>
    %cst_117 = arith.constant dense<0.000000e+00> : vector<2x128xf32>
    %175 = tpu.matmul %128, %174, %cst_117 {dimension_numbers = #tpu.dot_dimension_numbers<[1], [0], [0], [1], [0, 0, 1, 1], [], []>} : vector<2x32xf32>, vector<32x128xf32>, vector<2x128xf32> -> vector<2x128xf32>
    %176 = arith.addf %173, %175 : vector<2x128xf32>
    %c0_118 = arith.constant 0 : index
    %c0_119 = arith.constant 0 : index
    %177 = vector.load %arg10[%c0_118, %c0_119] : memref<1x128xf32, #tpu.memory_space<vmem>>, vector<1x128xf32>
    %178 = vector.broadcast %177 : vector<1x128xf32> to vector<2x128xf32>
    %179 = arith.addf %176, %178 : vector<2x128xf32>
    %180 = vector.extract_strided_slice %179 {offsets = [0, 0], sizes = [2, 96], strides = [1, 1]} : vector<2x128xf32> to vector<2x96xf32>
    %181 = arith.negf %180 : vector<2x96xf32>
    %182 = math.exp %181 : vector<2x96xf32>
    %cst_120 = arith.constant 1.000000e+00 : f32
    %183 = vector.broadcast %cst_120 : f32 to vector<2x96xf32>
    %184 = arith.addf %183, %182 : vector<2x96xf32>
    %185 = arith.divf %183, %184 : vector<2x96xf32>
    %186 = vector.extract_strided_slice %179 {offsets = [0, 96], sizes = [2, 32], strides = [1, 1]} : vector<2x128xf32> to vector<2x32xf32>
    %187 = math.tanh %186 : vector<2x32xf32>
    %188 = vector.extract_strided_slice %185 {offsets = [0, 0], sizes = [2, 32], strides = [1, 1]} : vector<2x96xf32> to vector<2x32xf32>
    %189 = vector.extract_strided_slice %185 {offsets = [0, 32], sizes = [2, 32], strides = [1, 1]} : vector<2x96xf32> to vector<2x32xf32>
    %190 = vector.extract_strided_slice %185 {offsets = [0, 64], sizes = [2, 32], strides = [1, 1]} : vector<2x96xf32> to vector<2x32xf32>
    %191 = arith.mulf %189, %126 : vector<2x32xf32>
    %192 = arith.mulf %188, %187 : vector<2x32xf32>
    %193 = arith.addf %191, %192 : vector<2x32xf32>
    %194 = math.tanh %193 : vector<2x32xf32>
    %195 = arith.mulf %190, %194 : vector<2x32xf32>
    %c0_121 = arith.constant 0 : index
    %c0_122 = arith.constant 0 : index
    %196 = vector.load %arg11[%c0_121, %c0_122] : memref<32x10xf32, #tpu.memory_space<vmem>>, vector<32x10xf32>
    %cst_123 = arith.constant dense<0.000000e+00> : vector<2x10xf32>
    %197 = tpu.matmul %195, %196, %cst_123 {dimension_numbers = #tpu.dot_dimension_numbers<[1], [0], [0], [1], [0, 0, 1, 1], [], []>} : vector<2x32xf32>, vector<32x10xf32>, vector<2x10xf32> -> vector<2x10xf32>
    %c0_124 = arith.constant 0 : index
    %c0_125 = arith.constant 0 : index
    %198 = vector.load %arg12[%c0_124, %c0_125] : memref<1x10xf32, #tpu.memory_space<vmem>>, vector<1x10xf32>
    %199 = vector.broadcast %198 : vector<1x10xf32> to vector<2x10xf32>
    %200 = arith.addf %197, %199 : vector<2x10xf32>
    %cst_126 = arith.constant dense<0xFF800000> : vector<2xf32>
    %201 = vector.multi_reduction <maximumf>, %200, %cst_126 [1] : vector<2x10xf32> to vector<2xf32>
    %202 = vector.shape_cast %201 : vector<2xf32> to vector<2x1xf32>
    %203 = vector.broadcast %202 : vector<2x1xf32> to vector<2x10xf32>
    %204 = arith.subf %200, %203 : vector<2x10xf32>
    %205 = math.exp %204 : vector<2x10xf32>
    %cst_127 = arith.constant dense<0.000000e+00> : vector<2xf32>
    %206 = vector.multi_reduction <add>, %205, %cst_127 [1] : vector<2x10xf32> to vector<2xf32>
    %207 = vector.shape_cast %206 : vector<2xf32> to vector<2x1xf32>
    %208 = math.log %207 : vector<2x1xf32>
    %209 = tpu.iota {dimensions = array<i32: 1>} : vector<2x10xi32>
    %cst_128 = arith.constant 0.000000e+00 : f32
    %210 = vector.broadcast %cst_128 : f32 to vector<2x10xf32>
    %211 = arith.cmpf oeq, %204, %210 : vector<2x10xf32>
    %c10_i32_129 = arith.constant 10 : i32
    %212 = vector.broadcast %c10_i32_129 : i32 to vector<2x10xi32>
    %213 = arith.select %211, %209, %212 : vector<2x10xi1>, vector<2x10xi32>
    %cst_130 = arith.constant dense<2147483647> : vector<2xi32>
    %214 = vector.multi_reduction <minsi>, %213, %cst_130 [1] : vector<2x10xi32> to vector<2xi32>
    %215 = vector.shape_cast %214 : vector<2xi32> to vector<2x1xi32>
    %216 = arith.mulf %205, %204 : vector<2x10xf32>
    %cst_131 = arith.constant dense<0.000000e+00> : vector<2xf32>
    %217 = vector.multi_reduction <add>, %216, %cst_131 [1] : vector<2x10xf32> to vector<2xf32>
    %218 = vector.shape_cast %217 : vector<2xf32> to vector<2x1xf32>
    %219 = tpu.reciprocal %207 {approx = true} : vector<2x1xf32> -> vector<2x1xf32>
    %220 = arith.mulf %218, %219 : vector<2x1xf32>
    %221 = arith.subf %208, %220 : vector<2x1xf32>
    %cst_132 = arith.constant 0.000000e+00 : f32
    %222 = vector.broadcast %cst_132 : f32 to vector<2x1xf32>
    %223 = arith.subf %222, %208 : vector<2x1xf32>
    %c1_i32 = arith.constant 1 : i32
    %224 = vector.broadcast %c1_i32 : i32 to vector<2x5xi32>
    %225 = arith.cmpi eq, %102, %224 : vector<2x5xi32>
    %226 = vector.shape_cast %215 : vector<2x1xi32> to vector<2x1xi32>
    %227 = vector.broadcast %226 : vector<2x1xi32> to vector<2x5xi32>
    %228 = arith.select %225, %227, %161 : vector<2x5xi1>, vector<2x5xi32>
    %229 = vector.shape_cast %223 : vector<2x1xf32> to vector<2x1xf32>
    %230 = vector.broadcast %229 : vector<2x1xf32> to vector<2x5xf32>
    %231 = arith.select %225, %230, %164 : vector<2x5xi1>, vector<2x5xf32>
    %232 = vector.shape_cast %221 : vector<2x1xf32> to vector<2x1xf32>
    %233 = vector.broadcast %232 : vector<2x1xf32> to vector<2x5xf32>
    %234 = arith.select %225, %233, %167 : vector<2x5xi1>, vector<2x5xf32>
    %235 = vector.broadcast %215 : vector<2x1xi32> to vector<2x10xi32>
    %236 = arith.cmpi eq, %101, %235 : vector<2x10xi32>
    %237 = arith.extui %236 : vector<2x10xi1> to vector<2x10xi32>
    %238 = arith.sitofp %237 : vector<2x10xi32> to vector<2x10xf32>
    %c0_133 = arith.constant 0 : index
    %c0_134 = arith.constant 0 : index
    %239 = vector.load %arg8[%c0_133, %c0_134] : memref<10x128xf32, #tpu.memory_space<vmem>>, vector<10x128xf32>
    %cst_135 = arith.constant dense<0.000000e+00> : vector<2x128xf32>
    %240 = tpu.matmul %238, %239, %cst_135 {dimension_numbers = #tpu.dot_dimension_numbers<[1], [0], [0], [1], [0, 0, 1, 1], [], []>} : vector<2x10xf32>, vector<10x128xf32>, vector<2x128xf32> -> vector<2x128xf32>
    %c0_136 = arith.constant 0 : index
    %c0_137 = arith.constant 0 : index
    %241 = vector.load %arg9[%c0_136, %c0_137] : memref<32x128xf32, #tpu.memory_space<vmem>>, vector<32x128xf32>
    %cst_138 = arith.constant dense<0.000000e+00> : vector<2x128xf32>
    %242 = tpu.matmul %195, %241, %cst_138 {dimension_numbers = #tpu.dot_dimension_numbers<[1], [0], [0], [1], [0, 0, 1, 1], [], []>} : vector<2x32xf32>, vector<32x128xf32>, vector<2x128xf32> -> vector<2x128xf32>
    %243 = arith.addf %240, %242 : vector<2x128xf32>
    %c0_139 = arith.constant 0 : index
    %c0_140 = arith.constant 0 : index
    %244 = vector.load %arg10[%c0_139, %c0_140] : memref<1x128xf32, #tpu.memory_space<vmem>>, vector<1x128xf32>
    %245 = vector.broadcast %244 : vector<1x128xf32> to vector<2x128xf32>
    %246 = arith.addf %243, %245 : vector<2x128xf32>
    %247 = vector.extract_strided_slice %246 {offsets = [0, 0], sizes = [2, 96], strides = [1, 1]} : vector<2x128xf32> to vector<2x96xf32>
    %248 = arith.negf %247 : vector<2x96xf32>
    %249 = math.exp %248 : vector<2x96xf32>
    %cst_141 = arith.constant 1.000000e+00 : f32
    %250 = vector.broadcast %cst_141 : f32 to vector<2x96xf32>
    %251 = arith.addf %250, %249 : vector<2x96xf32>
    %252 = arith.divf %250, %251 : vector<2x96xf32>
    %253 = vector.extract_strided_slice %246 {offsets = [0, 96], sizes = [2, 32], strides = [1, 1]} : vector<2x128xf32> to vector<2x32xf32>
    %254 = math.tanh %253 : vector<2x32xf32>
    %255 = vector.extract_strided_slice %252 {offsets = [0, 0], sizes = [2, 32], strides = [1, 1]} : vector<2x96xf32> to vector<2x32xf32>
    %256 = vector.extract_strided_slice %252 {offsets = [0, 32], sizes = [2, 32], strides = [1, 1]} : vector<2x96xf32> to vector<2x32xf32>
    %257 = vector.extract_strided_slice %252 {offsets = [0, 64], sizes = [2, 32], strides = [1, 1]} : vector<2x96xf32> to vector<2x32xf32>
    %258 = arith.mulf %256, %193 : vector<2x32xf32>
    %259 = arith.mulf %255, %254 : vector<2x32xf32>
    %260 = arith.addf %258, %259 : vector<2x32xf32>
    %261 = math.tanh %260 : vector<2x32xf32>
    %262 = arith.mulf %257, %261 : vector<2x32xf32>
    %c0_142 = arith.constant 0 : index
    %c0_143 = arith.constant 0 : index
    %263 = vector.load %arg11[%c0_142, %c0_143] : memref<32x10xf32, #tpu.memory_space<vmem>>, vector<32x10xf32>
    %cst_144 = arith.constant dense<0.000000e+00> : vector<2x10xf32>
    %264 = tpu.matmul %262, %263, %cst_144 {dimension_numbers = #tpu.dot_dimension_numbers<[1], [0], [0], [1], [0, 0, 1, 1], [], []>} : vector<2x32xf32>, vector<32x10xf32>, vector<2x10xf32> -> vector<2x10xf32>
    %c0_145 = arith.constant 0 : index
    %c0_146 = arith.constant 0 : index
    %265 = vector.load %arg12[%c0_145, %c0_146] : memref<1x10xf32, #tpu.memory_space<vmem>>, vector<1x10xf32>
    %266 = vector.broadcast %265 : vector<1x10xf32> to vector<2x10xf32>
    %267 = arith.addf %264, %266 : vector<2x10xf32>
    %cst_147 = arith.constant dense<0xFF800000> : vector<2xf32>
    %268 = vector.multi_reduction <maximumf>, %267, %cst_147 [1] : vector<2x10xf32> to vector<2xf32>
    %269 = vector.shape_cast %268 : vector<2xf32> to vector<2x1xf32>
    %270 = vector.broadcast %269 : vector<2x1xf32> to vector<2x10xf32>
    %271 = arith.subf %267, %270 : vector<2x10xf32>
    %272 = math.exp %271 : vector<2x10xf32>
    %cst_148 = arith.constant dense<0.000000e+00> : vector<2xf32>
    %273 = vector.multi_reduction <add>, %272, %cst_148 [1] : vector<2x10xf32> to vector<2xf32>
    %274 = vector.shape_cast %273 : vector<2xf32> to vector<2x1xf32>
    %275 = math.log %274 : vector<2x1xf32>
    %276 = tpu.iota {dimensions = array<i32: 1>} : vector<2x10xi32>
    %cst_149 = arith.constant 0.000000e+00 : f32
    %277 = vector.broadcast %cst_149 : f32 to vector<2x10xf32>
    %278 = arith.cmpf oeq, %271, %277 : vector<2x10xf32>
    %c10_i32_150 = arith.constant 10 : i32
    %279 = vector.broadcast %c10_i32_150 : i32 to vector<2x10xi32>
    %280 = arith.select %278, %276, %279 : vector<2x10xi1>, vector<2x10xi32>
    %cst_151 = arith.constant dense<2147483647> : vector<2xi32>
    %281 = vector.multi_reduction <minsi>, %280, %cst_151 [1] : vector<2x10xi32> to vector<2xi32>
    %282 = vector.shape_cast %281 : vector<2xi32> to vector<2x1xi32>
    %283 = arith.mulf %272, %271 : vector<2x10xf32>
    %cst_152 = arith.constant dense<0.000000e+00> : vector<2xf32>
    %284 = vector.multi_reduction <add>, %283, %cst_152 [1] : vector<2x10xf32> to vector<2xf32>
    %285 = vector.shape_cast %284 : vector<2xf32> to vector<2x1xf32>
    %286 = tpu.reciprocal %274 {approx = true} : vector<2x1xf32> -> vector<2x1xf32>
    %287 = arith.mulf %285, %286 : vector<2x1xf32>
    %288 = arith.subf %275, %287 : vector<2x1xf32>
    %cst_153 = arith.constant 0.000000e+00 : f32
    %289 = vector.broadcast %cst_153 : f32 to vector<2x1xf32>
    %290 = arith.subf %289, %275 : vector<2x1xf32>
    %c2_i32 = arith.constant 2 : i32
    %291 = vector.broadcast %c2_i32 : i32 to vector<2x5xi32>
    %292 = arith.cmpi eq, %102, %291 : vector<2x5xi32>
    %293 = vector.shape_cast %282 : vector<2x1xi32> to vector<2x1xi32>
    %294 = vector.broadcast %293 : vector<2x1xi32> to vector<2x5xi32>
    %295 = arith.select %292, %294, %228 : vector<2x5xi1>, vector<2x5xi32>
    %296 = vector.shape_cast %290 : vector<2x1xf32> to vector<2x1xf32>
    %297 = vector.broadcast %296 : vector<2x1xf32> to vector<2x5xf32>
    %298 = arith.select %292, %297, %231 : vector<2x5xi1>, vector<2x5xf32>
    %299 = vector.shape_cast %288 : vector<2x1xf32> to vector<2x1xf32>
    %300 = vector.broadcast %299 : vector<2x1xf32> to vector<2x5xf32>
    %301 = arith.select %292, %300, %234 : vector<2x5xi1>, vector<2x5xf32>
    %302 = vector.broadcast %282 : vector<2x1xi32> to vector<2x10xi32>
    %303 = arith.cmpi eq, %101, %302 : vector<2x10xi32>
    %304 = arith.extui %303 : vector<2x10xi1> to vector<2x10xi32>
    %305 = arith.sitofp %304 : vector<2x10xi32> to vector<2x10xf32>
    %c0_154 = arith.constant 0 : index
    %c0_155 = arith.constant 0 : index
    %306 = vector.load %arg8[%c0_154, %c0_155] : memref<10x128xf32, #tpu.memory_space<vmem>>, vector<10x128xf32>
    %cst_156 = arith.constant dense<0.000000e+00> : vector<2x128xf32>
    %307 = tpu.matmul %305, %306, %cst_156 {dimension_numbers = #tpu.dot_dimension_numbers<[1], [0], [0], [1], [0, 0, 1, 1], [], []>} : vector<2x10xf32>, vector<10x128xf32>, vector<2x128xf32> -> vector<2x128xf32>
    %c0_157 = arith.constant 0 : index
    %c0_158 = arith.constant 0 : index
    %308 = vector.load %arg9[%c0_157, %c0_158] : memref<32x128xf32, #tpu.memory_space<vmem>>, vector<32x128xf32>
    %cst_159 = arith.constant dense<0.000000e+00> : vector<2x128xf32>
    %309 = tpu.matmul %262, %308, %cst_159 {dimension_numbers = #tpu.dot_dimension_numbers<[1], [0], [0], [1], [0, 0, 1, 1], [], []>} : vector<2x32xf32>, vector<32x128xf32>, vector<2x128xf32> -> vector<2x128xf32>
    %310 = arith.addf %307, %309 : vector<2x128xf32>
    %c0_160 = arith.constant 0 : index
    %c0_161 = arith.constant 0 : index
    %311 = vector.load %arg10[%c0_160, %c0_161] : memref<1x128xf32, #tpu.memory_space<vmem>>, vector<1x128xf32>
    %312 = vector.broadcast %311 : vector<1x128xf32> to vector<2x128xf32>
    %313 = arith.addf %310, %312 : vector<2x128xf32>
    %314 = vector.extract_strided_slice %313 {offsets = [0, 0], sizes = [2, 96], strides = [1, 1]} : vector<2x128xf32> to vector<2x96xf32>
    %315 = arith.negf %314 : vector<2x96xf32>
    %316 = math.exp %315 : vector<2x96xf32>
    %cst_162 = arith.constant 1.000000e+00 : f32
    %317 = vector.broadcast %cst_162 : f32 to vector<2x96xf32>
    %318 = arith.addf %317, %316 : vector<2x96xf32>
    %319 = arith.divf %317, %318 : vector<2x96xf32>
    %320 = vector.extract_strided_slice %313 {offsets = [0, 96], sizes = [2, 32], strides = [1, 1]} : vector<2x128xf32> to vector<2x32xf32>
    %321 = math.tanh %320 : vector<2x32xf32>
    %322 = vector.extract_strided_slice %319 {offsets = [0, 0], sizes = [2, 32], strides = [1, 1]} : vector<2x96xf32> to vector<2x32xf32>
    %323 = vector.extract_strided_slice %319 {offsets = [0, 32], sizes = [2, 32], strides = [1, 1]} : vector<2x96xf32> to vector<2x32xf32>
    %324 = vector.extract_strided_slice %319 {offsets = [0, 64], sizes = [2, 32], strides = [1, 1]} : vector<2x96xf32> to vector<2x32xf32>
    %325 = arith.mulf %323, %260 : vector<2x32xf32>
    %326 = arith.mulf %322, %321 : vector<2x32xf32>
    %327 = arith.addf %325, %326 : vector<2x32xf32>
    %328 = math.tanh %327 : vector<2x32xf32>
    %329 = arith.mulf %324, %328 : vector<2x32xf32>
    %c0_163 = arith.constant 0 : index
    %c0_164 = arith.constant 0 : index
    %330 = vector.load %arg11[%c0_163, %c0_164] : memref<32x10xf32, #tpu.memory_space<vmem>>, vector<32x10xf32>
    %cst_165 = arith.constant dense<0.000000e+00> : vector<2x10xf32>
    %331 = tpu.matmul %329, %330, %cst_165 {dimension_numbers = #tpu.dot_dimension_numbers<[1], [0], [0], [1], [0, 0, 1, 1], [], []>} : vector<2x32xf32>, vector<32x10xf32>, vector<2x10xf32> -> vector<2x10xf32>
    %c0_166 = arith.constant 0 : index
    %c0_167 = arith.constant 0 : index
    %332 = vector.load %arg12[%c0_166, %c0_167] : memref<1x10xf32, #tpu.memory_space<vmem>>, vector<1x10xf32>
    %333 = vector.broadcast %332 : vector<1x10xf32> to vector<2x10xf32>
    %334 = arith.addf %331, %333 : vector<2x10xf32>
    %cst_168 = arith.constant dense<0xFF800000> : vector<2xf32>
    %335 = vector.multi_reduction <maximumf>, %334, %cst_168 [1] : vector<2x10xf32> to vector<2xf32>
    %336 = vector.shape_cast %335 : vector<2xf32> to vector<2x1xf32>
    %337 = vector.broadcast %336 : vector<2x1xf32> to vector<2x10xf32>
    %338 = arith.subf %334, %337 : vector<2x10xf32>
    %339 = math.exp %338 : vector<2x10xf32>
    %cst_169 = arith.constant dense<0.000000e+00> : vector<2xf32>
    %340 = vector.multi_reduction <add>, %339, %cst_169 [1] : vector<2x10xf32> to vector<2xf32>
    %341 = vector.shape_cast %340 : vector<2xf32> to vector<2x1xf32>
    %342 = math.log %341 : vector<2x1xf32>
    %343 = tpu.iota {dimensions = array<i32: 1>} : vector<2x10xi32>
    %cst_170 = arith.constant 0.000000e+00 : f32
    %344 = vector.broadcast %cst_170 : f32 to vector<2x10xf32>
    %345 = arith.cmpf oeq, %338, %344 : vector<2x10xf32>
    %c10_i32_171 = arith.constant 10 : i32
    %346 = vector.broadcast %c10_i32_171 : i32 to vector<2x10xi32>
    %347 = arith.select %345, %343, %346 : vector<2x10xi1>, vector<2x10xi32>
    %cst_172 = arith.constant dense<2147483647> : vector<2xi32>
    %348 = vector.multi_reduction <minsi>, %347, %cst_172 [1] : vector<2x10xi32> to vector<2xi32>
    %349 = vector.shape_cast %348 : vector<2xi32> to vector<2x1xi32>
    %350 = arith.mulf %339, %338 : vector<2x10xf32>
    %cst_173 = arith.constant dense<0.000000e+00> : vector<2xf32>
    %351 = vector.multi_reduction <add>, %350, %cst_173 [1] : vector<2x10xf32> to vector<2xf32>
    %352 = vector.shape_cast %351 : vector<2xf32> to vector<2x1xf32>
    %353 = tpu.reciprocal %341 {approx = true} : vector<2x1xf32> -> vector<2x1xf32>
    %354 = arith.mulf %352, %353 : vector<2x1xf32>
    %355 = arith.subf %342, %354 : vector<2x1xf32>
    %cst_174 = arith.constant 0.000000e+00 : f32
    %356 = vector.broadcast %cst_174 : f32 to vector<2x1xf32>
    %357 = arith.subf %356, %342 : vector<2x1xf32>
    %c3_i32 = arith.constant 3 : i32
    %358 = vector.broadcast %c3_i32 : i32 to vector<2x5xi32>
    %359 = arith.cmpi eq, %102, %358 : vector<2x5xi32>
    %360 = vector.shape_cast %349 : vector<2x1xi32> to vector<2x1xi32>
    %361 = vector.broadcast %360 : vector<2x1xi32> to vector<2x5xi32>
    %362 = arith.select %359, %361, %295 : vector<2x5xi1>, vector<2x5xi32>
    %363 = vector.shape_cast %357 : vector<2x1xf32> to vector<2x1xf32>
    %364 = vector.broadcast %363 : vector<2x1xf32> to vector<2x5xf32>
    %365 = arith.select %359, %364, %298 : vector<2x5xi1>, vector<2x5xf32>
    %366 = vector.shape_cast %355 : vector<2x1xf32> to vector<2x1xf32>
    %367 = vector.broadcast %366 : vector<2x1xf32> to vector<2x5xf32>
    %368 = arith.select %359, %367, %301 : vector<2x5xi1>, vector<2x5xf32>
    %c0_175 = arith.constant 0 : index
    %c0_176 = arith.constant 0 : index
    %369 = vector.load %arg13[%c0_175, %c0_176] : memref<2x5xi32, #tpu.memory_space<vmem>>, vector<2x5xi32>
    tpu.vector_store %arg13[%c0_175, %c0_176], %362 {strides = array<i32>} : memref<2x5xi32, #tpu.memory_space<vmem>>, vector<2x5xi32>,
    %c0_177 = arith.constant 0 : index
    %c0_178 = arith.constant 0 : index
    %370 = vector.load %arg14[%c0_177, %c0_178] : memref<2x5xf32, #tpu.memory_space<vmem>>, vector<2x5xf32>
    tpu.vector_store %arg14[%c0_177, %c0_178], %365 {strides = array<i32>} : memref<2x5xf32, #tpu.memory_space<vmem>>, vector<2x5xf32>,
    %c0_179 = arith.constant 0 : index
    %c0_180 = arith.constant 0 : index
    %371 = vector.load %arg15[%c0_179, %c0_180] : memref<2x5xf32, #tpu.memory_space<vmem>>, vector<2x5xf32>
    tpu.vector_store %arg15[%c0_179, %c0_180], %368 {strides = array<i32>} : memref<2x5xf32, #tpu.memory_space<vmem>>, vector<2x5xf32>,
    return
  }
}

</mosaic_0001>

<bundles_post_ra>
// kernel: sender_forward.1
= control target key start
LH: loop header
LB: loop body
LE: loop exit
PB: predicated region body
PF: predicated region fallthrough
CT: control target
= control target key end

     0   :  { %21 = vsyncpa [#allocation4], 0  ;;  %s5945_s0 = inlined_call_operand.vmem [shape: bf16[32,768], index: 0, kind: input, shape index: {}]   ;;  %s5946_s1 = inlined_call_operand.vmem [shape: bf16[768,256], index: 1, kind: input, shape index: {}]   ;;  %s5947_s2 = inlined_call_operand.vmem [shape: f32[1,256], index: 2, kind: input, shape index: {}]   ;;  %s5948_s3 = inlined_call_operand.vmem [shape: bf16[256,36], index: 3, kind: input, shape index: {}]   ;;  %s5949_s4 = inlined_call_operand.vmem [shape: f32[1,36], index: 4, kind: input, shape index: {}]   ;;  %s5950_s5 = inlined_call_operand.vmem [shape: f32[16,36,32], index: 5, kind: input, shape index: {}]   ;;  %s5951_s6 = inlined_call_operand.vmem [shape: f32[1,32], index: 6, kind: input, shape index: {}]   ;;  %s5952_s7 = inlined_call_operand.vmem [shape: f32[1,128], index: 7, kind: input, shape index: {}]   ;;  %s5953_s8 = inlined_call_operand.vmem [shape: f32[10,128], index: 8, kind: input, shape index: {}]   ;;  %s5954_s9 = inlined_call_operand.vmem [shape: f32[32,128], index: 9, kind: input, shape index: {}]   ;;  %s5955_s10 = inlined_call_operand.vmem [shape: f32[1,128], index: 10, kind: input, shape index: {}]   ;;  %s5956_s11 = inlined_call_operand.vmem [shape: f32[32,10], index: 11, kind: input, shape index: {}]   ;;  %s5957_s12 = inlined_call_operand.vmem [shape: f32[1,10], index: 12, kind: input, shape index: {}]   ;;  %s5958_s13 = inlined_call_operand.hbm [shape: s32[2,5], index: 13, kind: output, shape index: {0}]   ;;  %s5959_s14 = inlined_call_operand.hbm [shape: f32[2,5], index: 14, kind: output, shape index: {1}]   ;;  %s5960_s15 = inlined_call_operand.hbm [shape: f32[2,5], index: 15, kind: output, shape index: {2}]  }
   0x1   :  { %v4510_v0 = vld [vmem:[%s5946_s1 + $0x4] ss:$8 sps:$4 sm:$0xff]   ;;  %v4512_v1 = vld [vmem:[%s5946_s1] ss:$8 sps:$4 sm:$0xff]   ;;  %v4513_v2 = vld [vmem:[%s5946_s1 + $0x14] ss:$8 sps:$4 sm:$0xff]  }
   0x2   :  { %710 = vmatprep.subr.bf16.mxu0 %v4510_v0  ;;  %v4515_v3 = vld [vmem:[%s5946_s1 + $0x10] ss:$8 sps:$4 sm:$0xff]   ;;  %v4516_v4 = vld [vmem:[%s5946_s1 + $0x24] ss:$8 sps:$4 sm:$0xff]   ;;  %v4518_v5 = vld [vmem:[%s5946_s1 + $0x20] ss:$8 sps:$4 sm:$0xff]  }
   0x3   :  { %711 = vmatpush1.bf16.msra.mxu0 %v4512_v1  ;;  %v4519_v6 = vld [vmem:[%s5946_s1 + $0x34] ss:$8 sps:$4 sm:$0xff]   ;;  %v4521_v7 = vld [vmem:[%s5946_s1 + $0x30] ss:$8 sps:$4 sm:$0xff]   ;;  %v4522_v8 = vld [vmem:[%s5946_s1 + $0x44] ss:$8 sps:$4 sm:$0xff]  }
   0x4   :  { %712 = vmatprep.subr.bf16.mxu0 %v4513_v2  ;;  %v4524_v9 = vld [vmem:[%s5946_s1 + $0x40] ss:$8 sps:$4 sm:$0xff]   ;;  %v4525_v10 = vld [vmem:[%s5946_s1 + $0x54] ss:$8 sps:$4 sm:$0xff]   ;;  %v4527_v11 = vld [vmem:[%s5946_s1 + $0x50] ss:$8 sps:$4 sm:$0xff]  }
   0x5   :  { %v4528_v12 = vld [vmem:[%s5946_s1 + $0x64] ss:$8 sps:$4 sm:$0xff]   ;;  %v4530_v14 = vld [vmem:[%s5946_s1 + $0x60] ss:$8 sps:$4 sm:$0xff]   ;;  %v4531_v15 = vld [vmem:[%s5946_s1 + $0x74] ss:$8 sps:$4 sm:$0xff]  }
   0x6   :  { %v4560_v13 = vld [vmem:[%s5945_s0 + $0x4] ss:$24 sps:$4 sm:$0xff]   ;;  %v4533_v16 = vld [vmem:[%s5946_s1 + $0x70] ss:$8 sps:$4 sm:$0xff]   ;;  %v4536_v18 = vld [vmem:[%s5946_s1 + $0x80] ss:$8 sps:$4 sm:$0xff]  }
   0x7   :  { %713 = vmatpush1.bf16.msra.mxu0 %v4515_v3  ;;  %742 = vmatprep.mubr.bf16.mxu0 %v4560_v13  ;;  %v4534_v17 = vld [vmem:[%s5946_s1 + $0x84] ss:$8 sps:$4 sm:$0xff]   ;;  %v4537_v19 = vld [vmem:[%s5946_s1 + $0x94] ss:$8 sps:$4 sm:$0xff]   ;;  %v4539_v20 = vld [vmem:[%s5946_s1 + $0x90] ss:$8 sps:$4 sm:$0xff]  }
   0x8   :  { %714 = vmatprep.subr.bf16.mxu0 %v4516_v4  ;;  %v4540_v21 = vld [vmem:[%s5946_s1 + $0xa4] ss:$8 sps:$4 sm:$0xff]   ;;  %v4542_v22 = vld [vmem:[%s5946_s1 + $0xa0] ss:$8 sps:$4 sm:$0xff]   ;;  %v4543_v23 = vld [vmem:[%s5946_s1 + $0xb4] ss:$8 sps:$4 sm:$0xff]  }
   0x9   :  { %v4545_v24 = vld [vmem:[%s5946_s1 + $0xb0] ss:$8 sps:$4 sm:$0xff]   ;;  %v4546_v25 = vld [vmem:[%s5946_s1 + $0xc4] ss:$8 sps:$4 sm:$0xff]   ;;  %v4548_v26 = vld [vmem:[%s5946_s1 + $0xc0] ss:$8 sps:$4 sm:$0xff]  }
   0xa   :  { %v4549_v27 = vld [vmem:[%s5946_s1 + $0xd4] ss:$8 sps:$4 sm:$0xff]   ;;  %v4551_v28 = vld [vmem:[%s5946_s1 + $0xd0] ss:$8 sps:$4 sm:$0xff]   ;;  %v4552_v29 = vld [vmem:[%s5946_s1 + $0xe4] ss:$8 sps:$4 sm:$0xff]  }
   0xb   :  { %715 = vmatpush1.bf16.msra.mxu0 %v4518_v5  ;;  %v4554_v30 = vld [vmem:[%s5946_s1 + $0xe0] ss:$8 sps:$4 sm:$0xff]   ;;  %v4555_v31 = vld [vmem:[%s5946_s1 + $0xf4] ss:$8 sps:$4 sm:$0xff]   ;;  %v4557_v32 = vld [vmem:[%s5946_s1 + $0xf0] ss:$8 sps:$4 sm:$0xff]  }
   0xc   :  { %716 = vmatprep.subr.bf16.mxu0 %v4519_v6  ;;  %v4563_v33 = vld [vmem:[%s5946_s1 + $0x104] ss:$8 sps:$4 sm:$0xff]   ;;  %v4558_v34 = vld [vmem:[%s5945_s0] ss:$24 sps:$4 sm:$0xff]   ;;  %v4566_v37 = vld [vmem:[%s5946_s1 + $0x114] ss:$8 sps:$4 sm:$0xff]  }
   0xd   :  { %v4561_v35 = vld [vmem:[%s5946_s1 + $0x100] ss:$8 sps:$4 sm:$0xff]   ;;  %v4603_v36 = vld [vmem:[%s5945_s0 + $0x34] ss:$24 sps:$4 sm:$0xff]   ;;  %v4564_v38 = vld [vmem:[%s5946_s1 + $0x110] ss:$8 sps:$4 sm:$0xff]  }
   0xe   :  { %v4569_v39 = vld [vmem:[%s5946_s1 + $0x124] ss:$8 sps:$4 sm:$0xff]   ;;  %v4567_v40 = vld [vmem:[%s5946_s1 + $0x120] ss:$8 sps:$4 sm:$0xff]   ;;  %v4572_v42 = vld [vmem:[%s5946_s1 + $0x134] ss:$8 sps:$4 sm:$0xff]  }
   0xf   :  { %717 = vmatpush1.bf16.msra.mxu0 %v4521_v7  ;;  %v4608_v41 = vld [vmem:[%s5945_s0 + $0x30] ss:$24 sps:$4 sm:$0xff]   ;;  %v4614_v43 = vld [vmem:[%s5945_s0 + $0xc] ss:$24 sps:$4 sm:$0xff]   ;;  %v4578_v52 = vld [vmem:[%s5946_s1 + $0x154] ss:$8 sps:$4 sm:$0xff]  }
  0x10   :  { %718 = vmatprep.subr.bf16.mxu0 %v4522_v8  ;;  %v4672_v44 = vld [vmem:[%s5948_s3 + $0x40] sm:$0xff]   ;;  %v4674_v46 = vld [vmem:[%s5948_s3 + $0x48] sm:$0xff]   ;;  %v4570_v47 = vld [vmem:[%s5946_s1 + $0x130] ss:$8 sps:$4 sm:$0xff]  }
  0x11   :  { %v4673_v45 = vld [vmem:[%s5948_s3] sm:$0xff]   ;;  %3831 = vmatprep.subr.bf16.mxu1 %v4672_v44  ;;  %v4675_v49 = vld [vmem:[%s5948_s3 + $0x8] sm:$0xff]   ;;  %v4676_v50 = vld [vmem:[%s5948_s3 + $0x50] sm:$0xff]  }
  0x12   :  { %v4575_v48 = vld [vmem:[%s5946_s1 + $0x144] ss:$8 sps:$4 sm:$0xff]   ;;  %3832 = vmatpush3.bf16.msra.mxu1 %v4673_v45  ;;  %v4573_v51 = vld [vmem:[%s5946_s1 + $0x140] ss:$8 sps:$4 sm:$0xff]   ;;  %v4576_v53 = vld [vmem:[%s5946_s1 + $0x150] ss:$8 sps:$4 sm:$0xff]  }
  0x13   :  { %719 = vmatpush1.bf16.msra.mxu0 %v4524_v9  ;;  %3833 = vmatprep.subr.bf16.mxu1 %v4674_v46  ;;  %v4677_v54 = vld [vmem:[%s5948_s3 + $0x10] sm:$0xff]   ;;  %v4581_v55 = vld [vmem:[%s5946_s1 + $0x164] ss:$8 sps:$4 sm:$0xff]   ;;  %v4678_v56 = vld [vmem:[%s5948_s3 + $0x58] sm:$0xff]  }
  0x14   :  { %720 = vmatprep.subr.bf16.mxu0 %v4525_v10  ;;  %v4679_v57 = vld [vmem:[%s5948_s3 + $0x18] sm:$0xff]   ;;  %v4680_v58 = vld [vmem:[%s5948_s3 + $0x60] sm:$0xff]  }
  0x16   :  { %3834 = vmatpush3.bf16.msra.mxu1 %v4675_v49 }
  0x17   :  { %721 = vmatpush1.bf16.msra.mxu0 %v4527_v11  ;;  %3835 = vmatprep.subr.bf16.mxu1 %v4676_v50 }
  0x18   :  { %722 = vmatprep.subr.bf16.mxu0 %v4528_v12 }
  0x1a   :  { %3836 = vmatpush3.bf16.msra.mxu1 %v4677_v54 }
  0x1b   :  { %723 = vmatpush1.bf16.msra.mxu0 %v4530_v14  ;;  %3837 = vmatprep.subr.bf16.mxu1 %v4678_v56 }
  0x1c   :  { %724 = vmatprep.subr.bf16.mxu0 %v4531_v15 }
  0x1f   :  { %725 = vmatpush1.bf16.msra.mxu0 %v4533_v16 }
  0x20   :  { %726 = vmatprep.subr.bf16.mxu0 %v4534_v17 }
  0x23   :  { %727 = vmatpush1.bf16.msra.mxu0 %v4536_v18 }
  0x24   :  { %728 = vmatprep.subr.bf16.mxu0 %v4537_v19 }
  0x27   :  { %729 = vmatpush1.bf16.msra.mxu0 %v4539_v20 }
  0x28   :  { %730 = vmatprep.subr.bf16.mxu0 %v4540_v21 }
  0x2b   :  { %731 = vmatpush1.bf16.msra.mxu0 %v4542_v22 }
  0x2c   :  { %732 = vmatprep.subr.bf16.mxu0 %v4543_v23 }
  0x2f   :  { %733 = vmatpush1.bf16.msra.mxu0 %v4545_v24 }
  0x30   :  { %734 = vmatprep.subr.bf16.mxu0 %v4546_v25 }
  0x33   :  { %735 = vmatpush1.bf16.msra.mxu0 %v4548_v26 }
  0x34   :  { %736 = vmatprep.subr.bf16.mxu0 %v4549_v27 }
  0x37   :  { %737 = vmatpush1.bf16.msra.mxu0 %v4551_v28 }
  0x38   :  { %738 = vmatprep.subr.bf16.mxu0 %v4552_v29 }
  0x3b   :  { %739 = vmatpush1.bf16.msra.mxu0 %v4554_v30 }
  0x3c   :  { %740 = vmatprep.subr.bf16.mxu0 %v4555_v31 }
  0x3f   :  { %741 = vmatpush1.bf16.msra.mxu0 %v4557_v32 }
  0x40   :  { %763 = vmatprep.subr.bf16.mxu0 %v4563_v33 }
  0x42   :  { %743 = vmatmul.mubr.bf16.vlgmr.msra.gmra.mrb[0].mxu0 %v4558_v34 }
  0x43   :  { %764 = vmatpush1.bf16.msra.mxu0 %v4561_v35  ;;  %752 = vmatprep.mubr.bf16.mxu0 %v4603_v36 }
  0x44   :  { %765 = vmatprep.subr.bf16.mxu0 %v4566_v37 }
  0x47   :  { %766 = vmatpush1.bf16.msra.mxu0 %v4564_v38 }
  0x48   :  { %767 = vmatprep.subr.bf16.mxu0 %v4569_v39 }
  0x4a   :  { %753 = vmatmul.mubr.bf16.gmra.mrb[4].mxu0 %v4608_v41 }
  0x4b   :  { %768 = vmatpush1.bf16.msra.mxu0 %v4567_v40  ;;  %795 = vmatprep.mubr.bf16.mxu0 %v4614_v43 }
  0x4c   :  { %769 = vmatprep.subr.bf16.mxu0 %v4572_v42 }
  0x4f   :  { %770 = vmatpush1.bf16.msra.mxu0 %v4570_v47 }
  0x50   :  { %771 = vmatprep.subr.bf16.mxu0 %v4575_v48 }
  0x53   :  { %772 = vmatpush1.bf16.msra.mxu0 %v4573_v51 }
  0x54   :  { %773 = vmatprep.subr.bf16.mxu0 %v4578_v52 }
  0x55   :  { %22 = vsyncpa [#allocation6], 0  ;;  %v4579_v59 = vld [vmem:[%s5946_s1 + $0x160] ss:$8 sps:$4 sm:$0xff]   ;;  %v4584_v60 = vld [vmem:[%s5946_s1 + $0x174] ss:$8 sps:$4 sm:$0xff]   ;;  %3838 = vmatpush3.bf16.msra.mxu1 %v4679_v57 }
  0x56   :  { %v4681_v61 = vld [vmem:[%s5948_s3 + $0x20] sm:$0xff]   ;;  %3839 = vmatprep.subr.bf16.mxu1 %v4680_v58  ;;  %v4682_v62 = vld [vmem:[%s5948_s3 + $0x68] sm:$0xff]   ;;  %v4582_v63 = vld [vmem:[%s5946_s1 + $0x170] ss:$8 sps:$4 sm:$0xff]   ;;  %vm1090_vm0 = vcmask 1043456   ;;  %vm4816_vm1 = vmmov 0  }
  0x57   :  { %774 = vmatpush1.bf16.msra.mxu0 %v4576_v53  ;;  %v4587_v0 = vld [vmem:[%s5946_s1 + $0x184] ss:$8 sps:$4 sm:$0xff]   ;;  %v4585_v1 = vld [vmem:[%s5946_s1 + $0x180] ss:$8 sps:$4 sm:$0xff]   ;;  %v4590_v2 = vld [vmem:[%s5946_s1 + $0x194] ss:$8 sps:$4 sm:$0xff]  }
  0x58   :  { %775 = vmatprep.subr.bf16.mxu0 %v4581_v55  ;;  %v4588_v3 = vld [vmem:[%s5946_s1 + $0x190] ss:$8 sps:$4 sm:$0xff]   ;;  %v4593_v4 = vld [vmem:[%s5946_s1 + $0x1a4] ss:$8 sps:$4 sm:$0xff]   ;;  %v4591_v5 = vld [vmem:[%s5946_s1 + $0x1a0] ss:$8 sps:$4 sm:$0xff]  }
  0x59   :  { %3840 = vmatpush3.bf16.msra.mxu1 %v4681_v61  ;;  %v4596_v6 = vld [vmem:[%s5946_s1 + $0x1b4] ss:$8 sps:$4 sm:$0xff]   ;;  %v4594_v7 = vld [vmem:[%s5946_s1 + $0x1b0] ss:$8 sps:$4 sm:$0xff]   ;;  %v4599_v8 = vld [vmem:[%s5946_s1 + $0x1c4] ss:$8 sps:$4 sm:$0xff]   ;;  %v160_v61 = vlaneseq }
  0x5a   :  { %3841 = vmatprep.subr.bf16.mxu1 %v4682_v62  ;;  %v4597_v9 = vld [vmem:[%s5946_s1 + $0x1c0] ss:$8 sps:$4 sm:$0xff]   ;;  %v4602_v10 = vld [vmem:[%s5946_s1 + $0x1d4] ss:$8 sps:$4 sm:$0xff]   ;;  %v4600_v11 = vld [vmem:[%s5946_s1 + $0x1d0] ss:$8 sps:$4 sm:$0xff]  }
  0x5b   :  { %776 = vmatpush1.bf16.msra.mxu0 %v4579_v59  ;;  %v4607_v12 = vld [vmem:[%s5946_s1 + $0x1e4] ss:$8 sps:$4 sm:$0xff]   ;;  %v4605_v13 = vld [vmem:[%s5946_s1 + $0x1e0] ss:$8 sps:$4 sm:$0xff]   ;;  %v4611_v14 = vld [vmem:[%s5946_s1 + $0x1f4] ss:$8 sps:$4 sm:$0xff]  }
  0x5c   :  { %777 = vmatprep.subr.bf16.mxu0 %v4584_v60  ;;  %v4609_v15 = vld [vmem:[%s5946_s1 + $0x1f0] ss:$8 sps:$4 sm:$0xff]   ;;  %v4617_v16 = vld [vmem:[%s5946_s1 + $0x204] ss:$8 sps:$4 sm:$0xff]   ;;  %v4612_v17 = vld [vmem:[%s5945_s0 + $0x8] ss:$24 sps:$4 sm:$0xff]  }
  0x5d   :  { %v4615_v18 = vld [vmem:[%s5946_s1 + $0x200] ss:$8 sps:$4 sm:$0xff]   ;;  %v4657_v19 = vld [vmem:[%s5945_s0 + $0x3c] ss:$24 sps:$4 sm:$0xff]   ;;  %v4618_v21 = vld [vmem:[%s5946_s1 + $0x210] ss:$8 sps:$4 sm:$0xff]  }
  0x5e   :  { %v4620_v20 = vld [vmem:[%s5946_s1 + $0x214] ss:$8 sps:$4 sm:$0xff]   ;;  %v4623_v22 = vld [vmem:[%s5946_s1 + $0x224] ss:$8 sps:$4 sm:$0xff]   ;;  %v4659_v23 = vld [vmem:[%s5945_s0 + $0x38] ss:$24 sps:$4 sm:$0xff]  }
  0x5f   :  { %778 = vmatpush1.bf16.msra.mxu0 %v4582_v63  ;;  %v4621_v24 = vld [vmem:[%s5946_s1 + $0x220] ss:$8 sps:$4 sm:$0xff]   ;;  %v4668_v25 = vld [vmem:[%s5945_s0 + $0x14] ss:$24 sps:$4 sm:$0xff]   ;;  %v4624_v27 = vld [vmem:[%s5946_s1 + $0x230] ss:$8 sps:$4 sm:$0xff]  }
  0x60   :  { %779 = vmatprep.subr.bf16.mxu0 %v4587_v0  ;;  %v4626_v26 = vld [vmem:[%s5946_s1 + $0x234] ss:$8 sps:$4 sm:$0xff]   ;;  %v4629_v28 = vld [vmem:[%s5946_s1 + $0x244] ss:$8 sps:$4 sm:$0xff]   ;;  %v4627_v29 = vld [vmem:[%s5946_s1 + $0x240] ss:$8 sps:$4 sm:$0xff]  }
  0x61   :  { %v4632_v30 = vld [vmem:[%s5946_s1 + $0x254] ss:$8 sps:$4 sm:$0xff]   ;;  %v4630_v31 = vld [vmem:[%s5946_s1 + $0x250] ss:$8 sps:$4 sm:$0xff]   ;;  %v4635_v32 = vld [vmem:[%s5946_s1 + $0x264] ss:$8 sps:$4 sm:$0xff]  }
  0x62   :  { %v4633_v33 = vld [vmem:[%s5946_s1 + $0x260] ss:$8 sps:$4 sm:$0xff]   ;;  %v4638_v34 = vld [vmem:[%s5946_s1 + $0x274] ss:$8 sps:$4 sm:$0xff]   ;;  %v4636_v35 = vld [vmem:[%s5946_s1 + $0x270] ss:$8 sps:$4 sm:$0xff]  }
  0x63   :  { %780 = vmatpush1.bf16.msra.mxu0 %v4585_v1  ;;  %v4641_v36 = vld [vmem:[%s5946_s1 + $0x284] ss:$8 sps:$4 sm:$0xff]   ;;  %v4639_v37 = vld [vmem:[%s5946_s1 + $0x280] ss:$8 sps:$4 sm:$0xff]   ;;  %v4644_v38 = vld [vmem:[%s5946_s1 + $0x294] ss:$8 sps:$4 sm:$0xff]  }
  0x64   :  { %781 = vmatprep.subr.bf16.mxu0 %v4590_v2  ;;  %v4642_v39 = vld [vmem:[%s5946_s1 + $0x290] ss:$8 sps:$4 sm:$0xff]   ;;  %v4647_v40 = vld [vmem:[%s5946_s1 + $0x2a4] ss:$8 sps:$4 sm:$0xff]   ;;  %v4645_v41 = vld [vmem:[%s5946_s1 + $0x2a0] ss:$8 sps:$4 sm:$0xff]  }
  0x65   :  { %v4650_v42 = vld [vmem:[%s5946_s1 + $0x2b4] ss:$8 sps:$4 sm:$0xff]   ;;  %v4648_v43 = vld [vmem:[%s5946_s1 + $0x2b0] ss:$8 sps:$4 sm:$0xff]   ;;  %v4653_v44 = vld [vmem:[%s5946_s1 + $0x2c4] ss:$8 sps:$4 sm:$0xff]  }
  0x66   :  { %v4651_v45 = vld [vmem:[%s5946_s1 + $0x2c0] ss:$8 sps:$4 sm:$0xff]   ;;  %v4656_v46 = vld [vmem:[%s5946_s1 + $0x2d4] ss:$8 sps:$4 sm:$0xff]   ;;  %v4654_v47 = vld [vmem:[%s5946_s1 + $0x2d0] ss:$8 sps:$4 sm:$0xff]  }
  0x67   :  { %782 = vmatpush1.bf16.msra.mxu0 %v4588_v3  ;;  %v4662_v48 = vld [vmem:[%s5946_s1 + $0x2e4] ss:$8 sps:$4 sm:$0xff]   ;;  %v4660_v49 = vld [vmem:[%s5946_s1 + $0x2e0] ss:$8 sps:$4 sm:$0xff]   ;;  %v4665_v50 = vld [vmem:[%s5946_s1 + $0x2f4] ss:$8 sps:$4 sm:$0xff]  }
  0x68   :  { %783 = vmatprep.subr.bf16.mxu0 %v4593_v4  ;;  %v4663_v51 = vld [vmem:[%s5946_s1 + $0x2f0] ss:$8 sps:$4 sm:$0xff]   ;;  %v4669_v53 = vld [vmem:[%s5945_s0 + $0x44] ss:$24 sps:$4 sm:$0xff]   ;;  %v4683_v55 = vld [vmem:[%s5948_s3 + $0x28] sm:$0xff]   ;;  %v4814_v60 = vmov 0.0|0.0  }
  0x69   :  { %v4666_v52 = vld [vmem:[%s5945_s0 + $0x10] ss:$24 sps:$4 sm:$0xff]   ;;  %v4671_v54 = vld [vmem:[%s5945_s0 + $0x40] ss:$24 sps:$4 sm:$0xff]   ;;  %3842 = vmatpush3.bf16.msra.mxu1 %v4683_v55  ;;  %v161_v62 = vshrl.u32 %v160_v61, 7  ;;  %vm1069_vm2 = vcmask 293888  }
  0x6a   :  { %v4684_v56 = vld [vmem:[%s5948_s3 + $0x70] sm:$0xff]   ;;  %v4686_v58 = vld [vmem:[%s5948_s3 + $0x78] sm:$0xff]   ;;  %v158_v0 = vld [vmem:[%s5947_s2] sm:$0x3]  ;;  %vm2424_vm3 = vcmask 261120   ;;  %s4818_s2 = smov 64  }
  0x6b   :  { %784 = vmatpush1.bf16.msra.mxu0 %v4591_v5  ;;  %v4685_v57 = vld [vmem:[%s5948_s3 + $0x30] sm:$0xff]   ;;  %3843 = vmatprep.subr.bf16.mxu1 %v4684_v56  ;;  %v4687_v59 = vld [vmem:[%s5948_s3 + $0x38] sm:$0xff]   ;;  %v162_v63 = vsub.s32 0, %v161_v62  ;;  %v166_v1 = vsub.s32 1, %v161_v62  ;;  %v3712_v56 = vld [vmem:[%s5950_s5 + $0x80] sm:$0xff]  ;;  %vm2623_vm4 = vcmask 74752  }
  0x6c   :  { %785 = vmatprep.subr.bf16.mxu0 %v4596_v6  ;;  %v3711_v55 = vld [vmem:[%s5950_s5 + $0x78] sm:$0xff]  ;;  %vm2743_vm7 = vcmask 1041408   ;;  %vm4819_vm8 = vmmov 1   ;;  %vm2739_vm10 = vcmask 80896   ;;  %s4821_s29 = smov [#allocation7]  }
  0x6d   :  { %3844 = vmatpush3.bf16.msra.mxu1 %v4685_v57  ;;  %v163_v2 = vrot.slane %v158_v0, %v162_v63  ;;  %v167_v3 = vrot.slane %v158_v0, %v166_v1  ;;  %v4328_v62 = vpack.c.bf16 %v3712_v56, %v3711_v55  ;;  %v3713_v1 = vld [vmem:[%s5950_s5 + $0x88] sm:$0xff]  ;;  %v1075_v55 = vld [vmem:[%s5950_s5] sm:$0xff]  ;;  %vm5743_vm9 = vmpackc.low %vm2743_vm7, %vm4819_vm8  ;;  %s3559_s30 = sshll.u32 %s4821_s29, 4  ;;  %vm3529_vm8 = vcmask 33792   ;;  %s5893_s30 = int_to_ptr.vmem [resolvable:$true] %s3559_s30 }
  0x6e   :  { %3845 = vmatprep.subr.bf16.mxu1 %v4686_v58  ;;  %v1076_v56 = vld [vmem:[%s5950_s5 + $0x8] sm:$0xff] }
  0x6f   :  { %786 = vmatpush1.bf16.msra.mxu0 %v4594_v7 }
  0x70   :  { %787 = vmatprep.subr.bf16.mxu0 %v4599_v8 }
  0x71   :  { %3846 = vmatpush3.bf16.msra.mxu1 %v4687_v59 }
  0x72   :  { %4321 = vmatprep.subr.bf16.mxu1 %v4814_v60 }
  0x73   :  { %788 = vmatpush1.bf16.msra.mxu0 %v4597_v9 }
  0x74   :  { %789 = vmatprep.subr.bf16.mxu0 %v4602_v10 }
  0x77   :  { %790 = vmatpush1.bf16.msra.mxu0 %v4600_v11 }
  0x78   :  { %791 = vmatprep.subr.bf16.mxu0 %v4607_v12 }
  0x7b   :  { %792 = vmatpush1.bf16.msra.mxu0 %v4605_v13 }
  0x7c   :  { %793 = vmatprep.subr.bf16.mxu0 %v4611_v14 }
  0x7f   :  { %794 = vmatpush1.bf16.msra.mxu0 %v4609_v15 }
  0x80   :  { %816 = vmatprep.subr.bf16.mxu0 %v4617_v16 }
  0x82   :  { %796 = vmatmul.mubr.bf16.vlgmr.msra.gmra.mrb[0].mxu0 %v4612_v17 }
  0x83   :  { %817 = vmatpush1.bf16.msra.mxu0 %v4615_v18  ;;  %805 = vmatprep.mubr.bf16.mxu0 %v4657_v19 }
  0x84   :  { %818 = vmatprep.subr.bf16.mxu0 %v4620_v20 }
  0x87   :  { %819 = vmatpush1.bf16.msra.mxu0 %v4618_v21 }
  0x88   :  { %820 = vmatprep.subr.bf16.mxu0 %v4623_v22 }
  0x8a   :  { %806 = vmatmul.mubr.bf16.gmra.mrb[4].mxu0 %v4659_v23 }
  0x8b   :  { %821 = vmatpush1.bf16.msra.mxu0 %v4621_v24  ;;  %848 = vmatprep.mubr.bf16.mxu0 %v4668_v25 }
  0x8c   :  { %822 = vmatprep.subr.bf16.mxu0 %v4626_v26 }
  0x8f   :  { %823 = vmatpush1.bf16.msra.mxu0 %v4624_v27 }
  0x90   :  { %824 = vmatprep.subr.bf16.mxu0 %v4629_v28 }
  0x93   :  { %825 = vmatpush1.bf16.msra.mxu0 %v4627_v29 }
  0x94   :  { %826 = vmatprep.subr.bf16.mxu0 %v4632_v30 }
  0x97   :  { %827 = vmatpush1.bf16.msra.mxu0 %v4630_v31 }
  0x98   :  { %828 = vmatprep.subr.bf16.mxu0 %v4635_v32  ;;  %v3699_v32 = vld [vmem:[%s5950_s5 + $0x28] sm:$0xff] }
  0x9b   :  { %829 = vmatpush1.bf16.msra.mxu0 %v4633_v33  ;;  %v3700_v33 = vld [vmem:[%s5950_s5 + $0x30] sm:$0xff] }
  0x9c   :  { %830 = vmatprep.subr.bf16.mxu0 %v4638_v34  ;;  %v4322_v34 = vpack.c.bf16 %v3700_v33, %v3699_v32  ;;  %v3751_v32 = vld [vmem:[%s5950_s5 + $0x188] sm:$0xf] }
  0x9f   :  { %831 = vmatpush1.bf16.msra.mxu0 %v4636_v35  ;;  %v3701_v35 = vld [vmem:[%s5950_s5 + $0x38] sm:$0xff] }
  0xa0   :  { %832 = vmatprep.subr.bf16.mxu0 %v4641_v36  ;;  %v3702_v36 = vld [vmem:[%s5950_s5 + $0x40] sm:$0xff] }
  0xa3   :  { %833 = vmatpush1.bf16.msra.mxu0 %v4639_v37  ;;  %v4325_v37 = vpack.c.bf16 %v3702_v36, %v3701_v35  ;;  %v3762_v35 = vld [vmem:[%s5950_s5 + $0x1d0] sm:$0xff] }
  0xa4   :  { %834 = vmatprep.subr.bf16.mxu0 %v4644_v38  ;;  %v4815_v38 = vmov 0.0  }
  0xa7   :  { %835 = vmatpush1.bf16.msra.mxu0 %v4642_v39  ;;  %v3703_v39 = vld [vmem:[%s5950_s5 + $0x48] sm:$0xf] }
  0xa8   :  { %836 = vmatprep.subr.bf16.mxu0 %v4647_v40 }
  0xab   :  { %837 = vmatpush1.bf16.msra.mxu0 %v4645_v41  ;;  %v3682_v41 = vld [vmem:[%s5949_s4] ss:$0 sm:$0xff]  ;;  %s4817_s4 = smov 32  }
  0xac   :  { %838 = vmatprep.subr.bf16.mxu0 %v4650_v42 }
  0xaf   :  { %839 = vmatpush1.bf16.msra.mxu0 %v4648_v43 }
  0xb0   :  { %840 = vmatprep.subr.bf16.mxu0 %v4653_v44 }
  0xb3   :  { %841 = vmatpush1.bf16.msra.mxu0 %v4651_v45 }
  0xb4   :  { %842 = vmatprep.subr.bf16.mxu0 %v4656_v46 }
  0xb7   :  { %843 = vmatpush1.bf16.msra.mxu0 %v4654_v47 }
  0xb8   :  { %844 = vmatprep.subr.bf16.mxu0 %v4662_v48 }
  0xbb   :  { %845 = vmatpush1.bf16.msra.mxu0 %v4660_v49 }
  0xbc   :  { %846 = vmatprep.subr.bf16.mxu0 %v4665_v50 }
  0xbf   :  { %847 = vmatpush1.bf16.msra.mxu0 %v4663_v51 }
  0xc0   :  { %4423 = vmatprep.subr.bf16.mxu0 %v4814_v60 }
  0xc2   :  { %849 = vmatmul.mubr.bf16.vlgmr.msra.gmra.mrb[0].mxu0 %v4666_v52 }
  0xc3   :  { %858 = vmatprep.mubr.bf16.mxu0 %v4669_v53 }
  0xca   :  { %859 = vmatmul.mubr.bf16.gmra.mrb[4].mxu0 %v4671_v54 }
  0xcb   :  { %4231 = vmatprep.mubr.msk.f32.mxu0 %vm4816_vm1, %v4815_v38 }
 0x195   :  { %v850_v4 = vpop.f32.mrb[0].mxu0 }
 0x196   :  { %v4477_v5 = vadd.f32 %v850_v4, %v163_v2  ;;  %v852_v6 = vpop.f32.mrb[1].mxu0 }
 0x197   :  { %v4478_v7 = vadd.f32 %v852_v6, %v167_v3  ;;  %v854_v8 = vpop.f32.mrb[2].mxu0  ;;  %v3723_v6 = vld [vmem:[%s5950_s5 + $0xc8] sm:$0xff] }
 0x198   :  { %v4479_v9 = vadd.f32 %v854_v8, %v163_v2  ;;  %v856_v10 = vpop.f32.mrb[3].mxu0  ;;  %v869_v12 = vmax.f32 %v4477_v5, 0.0  ;;  %v3715_v8 = vld [vmem:[%s5950_s5 + $0x98] sm:$0xf] }
 0x199   :  { %v4480_v11 = vadd.f32 %v856_v10, %v167_v3  ;;  %v870_v14 = vmax.f32 %v4478_v7, 0.0  ;;  %v3724_v7 = vld [vmem:[%s5950_s5 + $0xd0] sm:$0xff]  ;;  %v3725_v10 = vld [vmem:[%s5950_s5 + $0xd8] sm:$0xff] }
 0x19a   :  { %v871_v13 = vmax.f32 %v4479_v9, 0.0  ;;  %v4334_v9 = vpack.c.bf16 %v3724_v7, %v3723_v6  ;;  %v3709_v6 = vld [vmem:[%s5950_s5 + $0x68] sm:$0xff] }
 0x19b   :  { %v872_v15 = vmax.f32 %v4480_v11, 0.0  ;;  %v3726_v11 = vld [vmem:[%s5950_s5 + $0xe0] sm:$0xff] }
 0x19c   :  { %v877_v16 = vpack.c.bf16 %v871_v13, %v869_v12  ;;  %v4337_v13 = vpack.c.bf16 %v3726_v11, %v3725_v10  ;;  %v3719_v10 = vld [vmem:[%s5950_s5 + $0xa8] sm:$0xff]  ;;  %v3710_v11 = vld [vmem:[%s5950_s5 + $0x70] sm:$0xf] }
 0x19d   :  { %v860_v17 = vpop.f32.mrb[4].mxu0  ;;  %v878_v18 = vpack.c.bf16 %v872_v15, %v870_v14  ;;  %v3735_v14 = vld [vmem:[%s5950_s5 + $0x118] sm:$0xff]  ;;  %v3736_v15 = vld [vmem:[%s5950_s5 + $0x120] sm:$0xff] }
 0x19e   :  { %v4481_v19 = vadd.f32 %v860_v17, %v163_v2  ;;  %v862_v20 = vpop.f32.mrb[5].mxu0  ;;  %v4340_v17 = vpack.c.bf16 %v3736_v15, %v3735_v14  ;;  %v3721_v14 = vld [vmem:[%s5950_s5 + $0xb8] sm:$0xff] }
 0x19f   :  { %v4482_v21 = vadd.f32 %v862_v20, %v167_v3  ;;  %v864_v22 = vpop.f32.mrb[6].mxu0  ;;  %1048 = vmatprep.mubr.bf16.mxu1 %v878_v18  ;;  %v3737_v18 = vld [vmem:[%s5950_s5 + $0x128] sm:$0xff] }
 0x1a0   :  { %v4483_v23 = vadd.f32 %v864_v22, %v163_v2  ;;  %v866_v24 = vpop.f32.mrb[7].mxu0  ;;  %1049 = vmatmul.mubr.bf16.vlgmr.msra.gmra.mrb[0].mxu1 %v877_v16  ;;  %v873_v26 = vmax.f32 %v4481_v19, 0.0  ;;  %v3714_v2 = vld [vmem:[%s5950_s5 + $0x90] sm:$0xff]  ;;  %v3727_v16 = vld [vmem:[%s5950_s5 + $0xe8] sm:$0xf] }
 0x1a1   :  { %v4484_v25 = vadd.f32 %v866_v24, %v167_v3  ;;  %v874_v28 = vmax.f32 %v4482_v21, 0.0  ;;  %4323 = vmatpush3.bf16.msra.mxu1 %v4322_v34  ;;  %v4331_v5 = vpack.c.bf16 %v3714_v2, %v3713_v1  ;;  %v3738_v19 = vld [vmem:[%s5950_s5 + $0x130] sm:$0xff]  ;;  %v3747_v22 = vld [vmem:[%s5950_s5 + $0x168] sm:$0xff]  ;;  %v3739_v24 = vld [vmem:[%s5950_s5 + $0x138] sm:$0xf] }
 0x1a2   :  { %v875_v27 = vmax.f32 %v4483_v23, 0.0  ;;  %4324 = vmatprep.subr.bf16.mxu1 %v4814_v60  ;;  %v4343_v21 = vpack.c.bf16 %v3738_v19, %v3737_v18  ;;  %v3748_v23 = vld [vmem:[%s5950_s5 + $0x170] sm:$0xff]  ;;  %v3761_v34 = vld [vmem:[%s5950_s5 + $0x1c8] sm:$0xff]  ;;  %v3707_v2 = vld [vmem:[%s5950_s5 + $0x58] sm:$0xff] }
 0x1a3   :  { %v876_v29 = vmax.f32 %v4484_v25, 0.0  ;;  %v4346_v25 = vpack.c.bf16 %v3748_v23, %v3747_v22  ;;  %v3706_v1 = vld [vmem:[%s5950_s5 + $0x50] sm:$0xff]  ;;  %v3731_v18 = vld [vmem:[%s5950_s5 + $0xf8] sm:$0xff]  ;;  %v3722_v19 = vld [vmem:[%s5950_s5 + $0xc0] sm:$0xf] }
 0x1a4   :  { %v879_v30 = vpack.c.bf16 %v875_v27, %v873_v26  ;;  %v3749_v26 = vld [vmem:[%s5950_s5 + $0x178] sm:$0xff]  ;;  %v3750_v27 = vld [vmem:[%s5950_s5 + $0x180] sm:$0xff]  ;;  %v3733_v22 = vld [vmem:[%s5950_s5 + $0x108] sm:$0xff] }
 0x1a5   :  { %v880_v31 = vpack.c.bf16 %v876_v29, %v874_v28  ;;  %4326 = vmatpush3.bf16.msra.mxu1 %v4325_v37  ;;  %v4349_v29 = vpack.c.bf16 %v3750_v27, %v3749_v26  ;;  %v4355_v37 = vpack.c.bf16 %v3762_v35, %v3761_v34  ;;  %v3743_v26 = vld [vmem:[%s5950_s5 + $0x148] sm:$0xff]  ;;  %v3734_v27 = vld [vmem:[%s5950_s5 + $0x110] sm:$0xf]  ;;  %v3755_v34 = vld [vmem:[%s5950_s5 + $0x198] sm:$0xff] }
 0x1a6   :  { %4012 = vmatprep.subr.mxu1 %v4815_v38  ;;  %v3746_v35 = vld [vmem:[%s5950_s5 + $0x160] sm:$0xf] }
 0x1a7   :  { %1056 = vmatprep.mubr.bf16.mxu1 %v880_v31  ;;  %v3760_v31 = vld [vmem:[%s5950_s5 + $0x1c0] sm:$0xff] }
 0x1a8   :  { %1057 = vmatmul.mubr.bf16.gmra.mrb[4].mxu1 %v879_v30  ;;  %v3759_v30 = vld [vmem:[%s5950_s5 + $0x1b8] sm:$0xff] }
 0x1a9   :  { %4013 = vmatpush3.msk.msra.mxu1 %vm1090_vm0, %v3703_v39  ;;  %4014 = vmatprep.mubr.msk.f32.mxu1 %vm4816_vm1, %v4815_v38  ;;  %v4352_v33 = vpack.c.bf16 %v3760_v31, %v3759_v30  ;;  %v3771_v39 = vld [vmem:[%s5950_s5 + $0x208] sm:$0xff]  ;;  %v3745_v30 = vld [vmem:[%s5950_s5 + $0x158] sm:$0xff] }
 0x1aa   :  { %4327 = vmatprep.subr.bf16.mxu1 %v4814_v60 }
 0x273   :  { %v3847_v40 = vpop.f32.mrb[0].mxu1 }
 0x274   :  { %v3848_v42 = vpop.f32.mrb[1].mxu1 }
 0x275   :  { %v3849_v43 = vadd.f32 %v3848_v42, %v3847_v40  ;;  %v3850_v44 = vpop.f32.mrb[2].mxu1  ;;  %v3772_v40 = vld [vmem:[%s5950_s5 + $0x210] sm:$0xff] }
 0x276   :  { %v3851_v45 = vpop.f32.mrb[3].mxu1  ;;  %v4358_v42 = vpack.c.bf16 %v3772_v40, %v3771_v39  ;;  %v3757_v39 = vld [vmem:[%s5950_s5 + $0x1a8] sm:$0xff] }
 0x277   :  { %v1051_v46 = vadd.f32 %v3849_v43, %v3682_v41  ;;  %v3852_v47 = vadd.f32 %v3851_v45, %v3850_v44  ;;  %v3773_v43 = vld [vmem:[%s5950_s5 + $0x218] sm:$0xff]  ;;  %v3774_v44 = vld [vmem:[%s5950_s5 + $0x220] sm:$0xff] }
 0x279   :  { %v1065_v48 = vmax.f32 %v1051_v46, 0.0  ;;  %v1054_v49 = vadd.f32 %v3852_v47, %v3682_v41  ;;  %v4361_v46 = vpack.c.bf16 %v3774_v44, %v3773_v43  ;;  %v3783_v47 = vld [vmem:[%s5950_s5 + $0x258] sm:$0xff]  ;;  %v3767_v43 = vld [vmem:[%s5950_s5 + $0x1e8] sm:$0xff]  ;;  %v3758_v44 = vld [vmem:[%s5950_s5 + $0x1b0] sm:$0xf] }
 0x27b   :  { %1070 = vst.msk [vmem:[#allocation2] sm:$0xff] %vm1069_vm2, %v1065_v48  ;;  %v1066_v50 = vmax.f32 %v1054_v49, 0.0  ;;  %v3853_v51 = vpop.f32.mrb[4].mxu1  ;;  %v3784_v48 = vld [vmem:[%s5950_s5 + $0x260] sm:$0xff]  ;;  %v3775_v49 = vld [vmem:[%s5950_s5 + $0x228] sm:$0xf] }
 0x27c   :  { %v3854_v52 = vpop.f32.mrb[5].mxu1 }
 0x27d   :  { %1071 = vst.msk [vmem:[#allocation2 + $0x8] sm:$0xff] %vm1069_vm2, %v1066_v50  ;;  %v3855_v53 = vadd.f32 %v3854_v52, %v3853_v51  ;;  %v3856_v54 = vpop.f32.mrb[6].mxu1  ;;  %v4364_v50 = vpack.c.bf16 %v3784_v48, %v3783_v47  ;;  %v3785_v51 = vld [vmem:[%s5950_s5 + $0x268] sm:$0xff]  ;;  %v3786_v52 = vld [vmem:[%s5950_s5 + $0x270] sm:$0xff]  ;;  %v3769_v47 = vld [vmem:[%s5950_s5 + $0x1f8] sm:$0xff] }
 0x27e   :  { %v3857_v57 = vpop.f32.mrb[7].mxu1 }
 0x27f   :  { %v1059_v58 = vadd.f32 %v3855_v53, %v3682_v41  ;;  %v3858_v59 = vadd.f32 %v3857_v57, %v3856_v54  ;;  %v4367_v54 = vpack.c.bf16 %v3786_v52, %v3785_v51  ;;  %v3787_v57 = vld [vmem:[%s5950_s5 + $0x278] sm:$0xf]  ;;  %v3770_v52 = vld [vmem:[%s5950_s5 + $0x200] sm:$0xf] }
 0x280   :  { %v3779_v51 = vld [vmem:[%s5950_s5 + $0x238] sm:$0xff] }
 0x281   :  { %v1067_v63 = vmax.f32 %v1059_v58, 0.0  ;;  %v1062_v0 = vadd.f32 %v3858_v59, %v3682_v41  ;;  %v3763_v41 = vld [vmem:[%s5950_s5 + $0x1d8] sm:$0xf]  ;;  %v4370_v58 = vpack.c.bf16 %v1076_v56, %v1075_v55  ;;  %v1077_v59 = vld [vmem:[%s5950_s5 + $0x10] sm:$0xff]  ;;  %v3781_v55 = vld [vmem:[%s5950_s5 + $0x248] sm:$0xff] }
 0x282   :  { %v1080_v3 = vld [vmem:[#allocation2 + $0x2] sm:$0x3]  ;;  %v1171_v12 = vld [vmem:[#allocation2 + $0x6] sm:$0x3]  ;;  %v1074_v7 = vld [vmem:[#allocation2] sm:$0x3] }
 0x283   :  { %1072 = vst.msk [vmem:[#allocation2 + $0x10] sm:$0xff] %vm1069_vm2, %v1067_v63  ;;  %v1068_v4 = vmax.f32 %v1062_v0, 0.0  ;;  %4015 = vmatmul.mubr.msk.f32.vlgmr.msra.gmra.mrb[8].mxu1 %vm1069_vm2, %v1080_v3  ;;  %v1079_v3 = vld [vmem:[%s5950_s5 + $0x20] sm:$0xf]  ;;  %v1164_v15 = vld [vmem:[#allocation2 + $0x4] sm:$0x3] }
 0x284   :  { %4329 = vmatpush3.bf16.msra.mxu1 %v4328_v62  ;;  %4027 = vmatprep.mubr.msk.f32.mxu1 %vm4816_vm1, %v4815_v38  ;;  %v1261_v20 = vld [vmem:[#allocation2 + $0xa] sm:$0x3]  ;;  %v1351_v28 = vld [vmem:[#allocation2 + $0xe] sm:$0x3]  ;;  %v1078_v62 = vld [vmem:[%s5950_s5 + $0x18] sm:$0xff] }
 0x285   :  { %1073 = vst.msk [vmem:[#allocation2 + $0x18] sm:$0xff] %vm1069_vm2, %v1068_v4  ;;  %4330 = vmatprep.subr.bf16.mxu1 %v4814_v60  ;;  %v4373_v0 = vpack.c.bf16 %v1078_v62, %v1077_v59  ;;  %v4376_v4 = vpack.c.bf16 %v3707_v2, %v3706_v1  ;;  %v1254_v23 = vld [vmem:[#allocation2 + $0x8] sm:$0x3]  ;;  %v1344_v31 = vld [vmem:[#allocation2 + $0xc] sm:$0x3] }
 0x288   :  { %4332 = vmatpush3.bf16.msra.mxu1 %v4331_v5  ;;  %v3708_v5 = vld [vmem:[%s5950_s5 + $0x60] sm:$0xff] }
 0x289   :  { %4025 = vmatprep.subr.mxu1 %v4815_v38 }
 0x28a   :  { %v1441_v36 = vld [vmem:[#allocation2 + $0x12] sm:$0x3]  ;;  %v1531_v45 = vld [vmem:[#allocation2 + $0x16] sm:$0x3]  ;;  %v1434_v40 = vld [vmem:[#allocation2 + $0x10] sm:$0x3] }
 0x28b   :  { %v1524_v48 = vld [vmem:[#allocation2 + $0x14] sm:$0x3] }
 0x28c   :  { %4026 = vmatpush3.msk.msra.mxu1 %vm1090_vm0, %v3715_v8  ;;  %v1621_v53 = vld [vmem:[#allocation2 + $0x1a] sm:$0x3]  ;;  %v1711_v63 = vld [vmem:[#allocation2 + $0x1e] sm:$0x3]  ;;  %v4379_v8 = vpack.c.bf16 %v3709_v6, %v3708_v5  ;;  %v1614_v56 = vld [vmem:[#allocation2 + $0x18] sm:$0x3] }
 0x28d   :  { %4028 = vmatmul.mubr.msk.f32.vlgmr.msra.gmra.mrb[10].mxu1 %vm1069_vm2, %v1171_v12  ;;  %4333 = vmatprep.subr.bf16.mxu1 %v4814_v60  ;;  %v1704_v59 = vld [vmem:[#allocation2 + $0x1c] sm:$0x3]  ;;  %v2421_v5 = vld [vmem:[%s5954_s9 + $0x8] sm:$0xff] }
 0x28e   :  { %4335 = vmatpush3.bf16.msra.mxu1 %v4334_v9  ;;  %4040 = vmatprep.mubr.msk.f32.mxu1 %vm4816_vm1, %v4815_v38  ;;  %v3718_v9 = vld [vmem:[%s5950_s5 + $0xa0] sm:$0xff] }
 0x28f   :  { %4336 = vmatprep.subr.bf16.mxu1 %v4814_v60  ;;  %v4382_v12 = vpack.c.bf16 %v3719_v10, %v3718_v9 }
 0x292   :  { %4338 = vmatpush3.bf16.msra.mxu1 %v4337_v13  ;;  %v3720_v13 = vld [vmem:[%s5950_s5 + $0xb0] sm:$0xff] }
 0x293   :  { %4038 = vmatprep.subr.mxu1 %v4815_v38 }
 0x296   :  { %4039 = vmatpush3.msk.msra.mxu1 %vm1090_vm0, %v3727_v16  ;;  %v4385_v16 = vpack.c.bf16 %v3721_v14, %v3720_v13 }
 0x297   :  { %4041 = vmatmul.mubr.msk.f32.vlgmr.msra.gmra.mrb[12].mxu1 %vm1069_vm2, %v1261_v20  ;;  %4339 = vmatprep.subr.bf16.mxu1 %v4814_v60 }
 0x298   :  { %4341 = vmatpush3.bf16.msra.mxu1 %v4340_v17  ;;  %4053 = vmatprep.mubr.msk.f32.mxu1 %vm4816_vm1, %v4815_v38  ;;  %v3730_v17 = vld [vmem:[%s5950_s5 + $0xf0] sm:$0xff] }
 0x299   :  { %4342 = vmatprep.subr.bf16.mxu1 %v4814_v60  ;;  %v4388_v20 = vpack.c.bf16 %v3731_v18, %v3730_v17 }
 0x29c   :  { %4344 = vmatpush3.bf16.msra.mxu1 %v4343_v21  ;;  %v3732_v21 = vld [vmem:[%s5950_s5 + $0x100] sm:$0xff] }
 0x29d   :  { %4051 = vmatprep.subr.mxu1 %v4815_v38 }
 0x2a0   :  { %4052 = vmatpush3.msk.msra.mxu1 %vm1090_vm0, %v3739_v24  ;;  %v4391_v24 = vpack.c.bf16 %v3733_v22, %v3732_v21 }
 0x2a1   :  { %4054 = vmatmul.mubr.msk.f32.vlgmr.msra.gmra.mrb[14].mxu1 %vm1069_vm2, %v1351_v28  ;;  %4345 = vmatprep.subr.bf16.mxu1 %v4814_v60 }
 0x2a2   :  { %4347 = vmatpush3.bf16.msra.mxu1 %v4346_v25  ;;  %4066 = vmatprep.mubr.msk.f32.mxu1 %vm4816_vm1, %v4815_v38  ;;  %v3742_v25 = vld [vmem:[%s5950_s5 + $0x140] sm:$0xff] }
 0x2a3   :  { %4348 = vmatprep.subr.bf16.mxu1 %v4814_v60  ;;  %v4394_v28 = vpack.c.bf16 %v3743_v26, %v3742_v25 }
 0x2a6   :  { %4350 = vmatpush3.bf16.msra.mxu1 %v4349_v29  ;;  %v3744_v29 = vld [vmem:[%s5950_s5 + $0x150] sm:$0xff] }
 0x2a7   :  { %4064 = vmatprep.subr.mxu1 %v4815_v38 }
 0x2aa   :  { %4065 = vmatpush3.msk.msra.mxu1 %vm1090_vm0, %v3751_v32  ;;  %v4397_v32 = vpack.c.bf16 %v3745_v30, %v3744_v29 }
 0x2ab   :  { %4067 = vmatmul.mubr.msk.f32.vlgmr.msra.gmra.mrb[16].mxu1 %vm1069_vm2, %v1441_v36  ;;  %4351 = vmatprep.subr.bf16.mxu1 %v4814_v60 }
 0x2ac   :  { %4353 = vmatpush3.bf16.msra.mxu1 %v4352_v33  ;;  %4079 = vmatprep.mubr.msk.f32.mxu1 %vm4816_vm1, %v4815_v38  ;;  %v3754_v33 = vld [vmem:[%s5950_s5 + $0x190] sm:$0xff] }
 0x2ad   :  { %4354 = vmatprep.subr.bf16.mxu1 %v4814_v60  ;;  %v4400_v36 = vpack.c.bf16 %v3755_v34, %v3754_v33 }
 0x2b0   :  { %4356 = vmatpush3.bf16.msra.mxu1 %v4355_v37  ;;  %v3756_v37 = vld [vmem:[%s5950_s5 + $0x1a0] sm:$0xff] }
 0x2b1   :  { %4077 = vmatprep.subr.mxu1 %v4815_v38 }
 0x2b4   :  { %4078 = vmatpush3.msk.msra.mxu1 %vm1090_vm0, %v3763_v41  ;;  %v4403_v41 = vpack.c.bf16 %v3757_v39, %v3756_v37 }
 0x2b5   :  { %4080 = vmatmul.mubr.msk.f32.vlgmr.msra.gmra.mrb[18].mxu1 %vm1069_vm2, %v1531_v45  ;;  %4357 = vmatprep.subr.bf16.mxu1 %v4814_v60 }
 0x2b6   :  { %4359 = vmatpush3.bf16.msra.mxu1 %v4358_v42  ;;  %4092 = vmatprep.mubr.msk.f32.mxu1 %vm4816_vm1, %v4815_v38  ;;  %v3766_v42 = vld [vmem:[%s5950_s5 + $0x1e0] sm:$0xff] }
 0x2b7   :  { %4360 = vmatprep.subr.bf16.mxu1 %v4814_v60  ;;  %v4406_v45 = vpack.c.bf16 %v3767_v43, %v3766_v42 }
 0x2ba   :  { %4362 = vmatpush3.bf16.msra.mxu1 %v4361_v46  ;;  %v3768_v46 = vld [vmem:[%s5950_s5 + $0x1f0] sm:$0xff] }
 0x2bb   :  { %4090 = vmatprep.subr.mxu1 %v4815_v38 }
 0x2be   :  { %4091 = vmatpush3.msk.msra.mxu1 %vm1090_vm0, %v3775_v49  ;;  %v4409_v49 = vpack.c.bf16 %v3769_v47, %v3768_v46 }
 0x2bf   :  { %4093 = vmatmul.mubr.msk.f32.vlgmr.msra.gmra.mrb[20].mxu1 %vm1069_vm2, %v1621_v53  ;;  %4363 = vmatprep.subr.bf16.mxu1 %v4814_v60 }
 0x2c0   :  { %4365 = vmatpush3.bf16.msra.mxu1 %v4364_v50  ;;  %4105 = vmatprep.mubr.msk.f32.mxu1 %vm4816_vm1, %v4815_v38  ;;  %v3778_v50 = vld [vmem:[%s5950_s5 + $0x230] sm:$0xff] }
 0x2c1   :  { %4366 = vmatprep.subr.bf16.mxu1 %v4814_v60  ;;  %v4412_v53 = vpack.c.bf16 %v3779_v51, %v3778_v50  ;;  %v3806_v51 = vld [vmem:[%s5951_s6] ss:$0 sm:$0xff] }
 0x2c4   :  { %4368 = vmatpush3.bf16.msra.mxu1 %v4367_v54  ;;  %v3780_v54 = vld [vmem:[%s5950_s5 + $0x240] sm:$0xff] }
 0x2c5   :  { %4103 = vmatprep.subr.mxu1 %v4815_v38 }
 0x2c8   :  { %4104 = vmatpush3.msk.msra.mxu1 %vm1090_vm0, %v3787_v57  ;;  %v4415_v57 = vpack.c.bf16 %v3781_v55, %v3780_v54  ;;  %v3808_v54 = vld [vmem:[%s5952_s7] ss:$0 sm:$0xff] }
 0x2c9   :  { %4106 = vmatmul.mubr.msk.f32.vlgmr.msra.gmra.mrb[22].mxu1 %vm1069_vm2, %v1711_v63  ;;  %4369 = vmatprep.subr.bf16.mxu1 %v4814_v60 }
 0x2ca   :  { %4371 = vmatpush3.bf16.msra.mxu1 %v4370_v58  ;;  %4118 = vmatprep.mubr.msk.f32.mxu1 %vm4816_vm1, %v4815_v38  ;;  %v3782_v58 = vld [vmem:[%s5950_s5 + $0x250] sm:$0xf] }
 0x2cb   :  { %4372 = vmatprep.subr.bf16.mxu1 %v4814_v60 }
 0x2ce   :  { %4374 = vmatpush3.bf16.msra.mxu1 %v4373_v0 }
 0x2cf   :  { %4116 = vmatprep.subr.mxu1 %v4815_v38 }
 0x2d2   :  { %4117 = vmatpush3.msk.msra.mxu1 %vm1090_vm0, %v1079_v3 }
 0x2d3   :  { %4119 = vmatmul.mubr.msk.f32.vlgmr.msra.gmra.mrb[24].mxu1 %vm1069_vm2, %v1074_v7  ;;  %4375 = vmatprep.subr.bf16.mxu1 %v4814_v60  ;;  %v2422_v7 = vld [vmem:[%s5954_s9 + $0x10] sm:$0xff] }
 0x2d4   :  { %4377 = vmatpush3.bf16.msra.mxu1 %v4376_v4  ;;  %4131 = vmatprep.mubr.msk.f32.mxu1 %vm4816_vm1, %v4815_v38  ;;  %v2420_v4 = vld [vmem:[%s5954_s9] sm:$0xff] }
 0x2d5   :  { %4378 = vmatprep.subr.bf16.mxu1 %v4814_v60  ;;  %v5650_v6 = vpack.c.bf16 %v2421_v5, %v2420_v4 }
 0x2d8   :  { %4380 = vmatpush3.bf16.msra.mxu1 %v4379_v8  ;;  %v2423_v8 = vld [vmem:[%s5954_s9 + $0x18] sm:$0xff] }
 0x2d9   :  { %4129 = vmatprep.subr.mxu1 %v4815_v38  ;;  %v5660_v9 = vpack.c.bf16 %v2423_v8, %v2422_v7 }
 0x2dc   :  { %4130 = vmatpush3.msk.msra.mxu1 %vm1090_vm0, %v3710_v11 }
 0x2dd   :  { %4132 = vmatmul.mubr.msk.f32.vlgmr.msra.gmra.mrb[26].mxu1 %vm1069_vm2, %v1164_v15  ;;  %4381 = vmatprep.subr.bf16.mxu1 %v4814_v60 }
 0x2de   :  { %4383 = vmatpush3.bf16.msra.mxu1 %v4382_v12  ;;  %4144 = vmatprep.mubr.msk.f32.mxu1 %vm4816_vm1, %v4815_v38 }
 0x2df   :  { %4384 = vmatprep.subr.bf16.mxu1 %v4814_v60 }
 0x2e2   :  { %4386 = vmatpush3.bf16.msra.mxu1 %v4385_v16 }
 0x2e3   :  { %4142 = vmatprep.subr.mxu1 %v4815_v38 }
 0x2e6   :  { %4143 = vmatpush3.msk.msra.mxu1 %vm1090_vm0, %v3722_v19 }
 0x2e7   :  { %4145 = vmatmul.mubr.msk.f32.vlgmr.msra.gmra.mrb[28].mxu1 %vm1069_vm2, %v1254_v23  ;;  %4387 = vmatprep.subr.bf16.mxu1 %v4814_v60 }
 0x2e8   :  { %4389 = vmatpush3.bf16.msra.mxu1 %v4388_v20  ;;  %4157 = vmatprep.mubr.msk.f32.mxu1 %vm4816_vm1, %v4815_v38 }
 0x2e9   :  { %4390 = vmatprep.subr.bf16.mxu1 %v4814_v60 }
 0x2ec   :  { %4392 = vmatpush3.bf16.msra.mxu1 %v4391_v24 }
 0x2ed   :  { %4155 = vmatprep.subr.mxu1 %v4815_v38 }
 0x2f0   :  { %4156 = vmatpush3.msk.msra.mxu1 %vm1090_vm0, %v3734_v27 }
 0x2f1   :  { %4158 = vmatmul.mubr.msk.f32.vlgmr.msra.gmra.mrb[30].mxu1 %vm1069_vm2, %v1344_v31  ;;  %4393 = vmatprep.subr.bf16.mxu1 %v4814_v60 }
 0x2f2   :  { %4395 = vmatpush3.bf16.msra.mxu1 %v4394_v28  ;;  %4170 = vmatprep.mubr.msk.f32.mxu1 %vm4816_vm1, %v4815_v38 }
 0x2f3   :  { %4396 = vmatprep.subr.bf16.mxu1 %v4814_v60 }
 0x2f6   :  { %4398 = vmatpush3.bf16.msra.mxu1 %v4397_v32 }
 0x2f7   :  { %4168 = vmatprep.subr.mxu1 %v4815_v38 }
 0x2fa   :  { %4169 = vmatpush3.msk.msra.mxu1 %vm1090_vm0, %v3746_v35 }
 0x2fb   :  { %4171 = vmatmul.mubr.msk.f32.vlgmr.msra.gmra.mrb[32].mxu1 %vm1069_vm2, %v1434_v40  ;;  %4399 = vmatprep.subr.bf16.mxu1 %v4814_v60 }
 0x2fc   :  { %4401 = vmatpush3.bf16.msra.mxu1 %v4400_v36  ;;  %4183 = vmatprep.mubr.msk.f32.mxu1 %vm4816_vm1, %v4815_v38 }
 0x2fd   :  { %4402 = vmatprep.subr.bf16.mxu1 %v4814_v60 }
 0x300   :  { %4404 = vmatpush3.bf16.msra.mxu1 %v4403_v41 }
 0x301   :  { %4181 = vmatprep.subr.mxu1 %v4815_v38 }
 0x304   :  { %4182 = vmatpush3.msk.msra.mxu1 %vm1090_vm0, %v3758_v44 }
 0x305   :  { %4184 = vmatmul.mubr.msk.f32.vlgmr.msra.gmra.mrb[34].mxu1 %vm1069_vm2, %v1524_v48  ;;  %4405 = vmatprep.subr.bf16.mxu1 %v4814_v60 }
 0x306   :  { %4407 = vmatpush3.bf16.msra.mxu1 %v4406_v45  ;;  %4196 = vmatprep.mubr.msk.f32.mxu1 %vm4816_vm1, %v4815_v38 }
 0x307   :  { %4408 = vmatprep.subr.bf16.mxu1 %v4814_v60 }
 0x30a   :  { %4410 = vmatpush3.bf16.msra.mxu1 %v4409_v49 }
 0x30b   :  { %4194 = vmatprep.subr.mxu1 %v4815_v38 }
 0x30e   :  { %4195 = vmatpush3.msk.msra.mxu1 %vm1090_vm0, %v3770_v52 }
 0x30f   :  { %4197 = vmatmul.mubr.msk.f32.vlgmr.msra.gmra.mrb[36].mxu1 %vm1069_vm2, %v1614_v56  ;;  %4411 = vmatprep.subr.bf16.mxu1 %v4814_v60  ;;  %v5680_v56 = vld [vmem:[%s5955_s10] ss:$0 sm:$0xff] }
 0x310   :  { %4413 = vmatpush3.bf16.msra.mxu1 %v4412_v53  ;;  %4209 = vmatprep.mubr.msk.f32.mxu1 %vm4816_vm1, %v4815_v38 }
 0x311   :  { %4414 = vmatprep.subr.bf16.mxu1 %v4814_v60 }
 0x314   :  { %4416 = vmatpush3.bf16.msra.mxu1 %v4415_v57 }
 0x315   :  { %4207 = vmatprep.subr.mxu1 %v4815_v38 }
 0x318   :  { %4208 = vmatpush3.msk.msra.mxu1 %vm1090_vm0, %v3782_v58 }
 0x319   :  { %4210 = vmatmul.mubr.msk.f32.vlgmr.msra.gmra.mrb[38].mxu1 %vm1069_vm2, %v1704_v59  ;;  %4417 = vmatprep.subr.bf16.mxu1 %v4814_v60 }
 0x31a   :  { %4220 = vmatprep.mubr.msk.f32.mxu1 %vm4816_vm1, %v4815_v38  ;;  %4419 = vmatpush3.bf16.msra.mxu1 %v5650_v6 }
 0x31b   :  { %4420 = vmatprep.subr.bf16.mxu1 %v4814_v60 }
 0x31e   :  { %4422 = vmatpush3.bf16.msra.mxu1 %v5660_v9 }
 0x31f   :  { %4429 = vmatprep.subr.bf16.mxu1 %v4814_v60 }
 0x356   :  { %v1160_v62 = vpop.f32.mrb[8].mxu1 }
 0x357   :  { %v4016_v63 = vpop.f32.mrb[9].mxu1 }
 0x360   :  { %v1250_v0 = vpop.f32.mrb[10].mxu1 }
 0x361   :  { %v4029_v1 = vpop.f32.mrb[11].mxu1 }
 0x36a   :  { %v1340_v2 = vpop.f32.mrb[12].mxu1 }
 0x36b   :  { %v4042_v3 = vpop.f32.mrb[13].mxu1 }
 0x374   :  { %v1430_v10 = vpop.f32.mrb[14].mxu1 }
 0x375   :  { %v4055_v11 = vpop.f32.mrb[15].mxu1 }
 0x376   :  { %v2538_v11 = vld [vmem:[%s5956_s11 + $0x8] sm:$0xff] }
 0x37e   :  { %v1520_v12 = vpop.f32.mrb[16].mxu1 }
 0x37f   :  { %v4068_v13 = vpop.f32.mrb[17].mxu1 }
 0x388   :  { %v1610_v14 = vpop.f32.mrb[18].mxu1 }
 0x389   :  { %v4081_v15 = vpop.f32.mrb[19].mxu1 }
 0x392   :  { %v1700_v16 = vpop.f32.mrb[20].mxu1 }
 0x393   :  { %v4094_v17 = vpop.f32.mrb[21].mxu1 }
 0x39c   :  { %v1790_v18 = vpop.f32.mrb[22].mxu1 }
 0x39d   :  { %v4107_v19 = vpop.f32.mrb[23].mxu1 }
 0x3a6   :  { %v1866_v20 = vpop.f32.mrb[24].mxu1 }
 0x3a7   :  { %v1867_v21 = vadd.f32 %v1866_v20, %v1160_v62  ;;  %v4120_v22 = vpop.f32.mrb[25].mxu1  ;;  %v5723_v20 = vld [vmem:[%s5957_s12] ss:$0 sm:$0xff] }
 0x3b0   :  { %v1942_v23 = vpop.f32.mrb[26].mxu1 }
 0x3b1   :  { %v1943_v24 = vadd.f32 %v1942_v23, %v1250_v0  ;;  %v4133_v25 = vpop.f32.mrb[27].mxu1 }
 0x3b3   :  { %v2402_v26 = vadd.f32 %v1943_v24, %v1867_v21 }
 0x3ba   :  { %v2018_v27 = vpop.f32.mrb[28].mxu1 }
 0x3bb   :  { %v2019_v28 = vadd.f32 %v2018_v27, %v1340_v2  ;;  %v4146_v29 = vpop.f32.mrb[29].mxu1  ;;  %v5728_v27 = vand.u32 127, %v160_v61  ;;  %v2667_v61 = vld [vmem:[%s5953_s8] sm:$0xff] }
 0x3bd   :  { %vm2660_vm14 = vcmp.eq.s32.totalorder %v5728_v27, 0  ;;  %vm2953_vm15 = vcmp.eq.s32.totalorder %v5728_v27, 1 }
 0x3c4   :  { %v2094_v30 = vpop.f32.mrb[30].mxu1 }
 0x3c5   :  { %v2095_v31 = vadd.f32 %v2094_v30, %v1430_v10  ;;  %v4159_v32 = vpop.f32.mrb[31].mxu1  ;;  %v2537_v10 = vld [vmem:[%s5956_s11] sm:$0xff] }
 0x3c6   :  { %v5697_v13 = vpack.c.bf16 %v2538_v11, %v2537_v10 }
 0x3c7   :  { %v2403_v33 = vadd.f32 %v2095_v31, %v2019_v28 }
 0x3c8   :  { %4425 = vmatpush3.bf16.msra.mxu0 %v5697_v13 }
 0x3c9   :  { %v2406_v34 = vadd.f32 %v2403_v33, %v2402_v26  ;;  %4426 = vmatprep.subr.bf16.mxu0 %v4814_v60 }
 0x3ce   :  { %v2170_v35 = vpop.f32.mrb[32].mxu1 }
 0x3cf   :  { %v2171_v36 = vadd.f32 %v2170_v35, %v1520_v12  ;;  %v4172_v37 = vpop.f32.mrb[33].mxu1  ;;  %v2539_v12 = vld [vmem:[%s5956_s11 + $0x10] sm:$0xff] }
 0x3d8   :  { %v2246_v39 = vpop.f32.mrb[34].mxu1 }
 0x3d9   :  { %v2247_v40 = vadd.f32 %v2246_v39, %v1610_v14  ;;  %v4185_v41 = vpop.f32.mrb[35].mxu1  ;;  %v2540_v14 = vld [vmem:[%s5956_s11 + $0x18] sm:$0xff]  ;;  %v2668_v39 = vld [vmem:[%s5953_s8 + $0x8] sm:$0x3]  ;;  %s4820_s8 = smov [#allocation5]  }
 0x3da   :  { %v5703_v15 = vpack.c.bf16 %v2540_v14, %v2539_v12  ;;  %s3549_s28 = sshll.u32 %s4820_s8, 4  ;;  %s3550_s28 = int_to_ptr.vmem [resolvable:$true] %s3549_s28 }
 0x3db   :  { %v2404_v42 = vadd.f32 %v2247_v40, %v2171_v36  ;;  %v5741_v40 = vpack.c.bf16 %v2668_v39, %v2667_v61  ;;  %s4744_s16 = scalar_lea.vmem %s3550_s28, 32  ;;  %p4749_p1 = scmp.lt.s32.totalorder %s3550_s28, %s3550_s28 }
 0x3dc   :  { %4428 = vmatpush3.bf16.msra.mxu0 %v5703_v15  ;;  %p4745_p0 = scmp.ne.s32.totalorder %s3550_s28, %s4744_s16  ;;  %p4750_p2 = scmp.lt.s32.totalorder %s4744_s16, %s4744_s16 }
 0x3dd   :  { %4439 = vmatprep.subr.bf16.mxu0 %v4814_v60 }
 0x3de   :  { %p4751_p3 = por %p4750_p2, %p4749_p1 }
 0x3e0   :  { %p4752_p4 = pnand %p4751_p3, %p4745_p0 }
 0x3e2   :  { %v2322_v43 = vpop.f32.mrb[36].mxu1 }
 0x3e3   :  { %v2323_v44 = vadd.f32 %v2322_v43, %v1700_v16  ;;  %v4198_v45 = vpop.f32.mrb[37].mxu1 }
 0x3ec   :  { %v2398_v46 = vpop.f32.mrb[38].mxu1 }
 0x3ed   :  { %v2399_v47 = vadd.f32 %v2398_v46, %v1790_v18  ;;  %v4211_v48 = vpop.f32.mrb[39].mxu1 }
 0x3ef   :  { %v2405_v49 = vadd.f32 %v2399_v47, %v2323_v44 }
 0x3f1   :  { %v2407_v50 = vadd.f32 %v2405_v49, %v2404_v42 }
 0x3f3   :  { %v2408_v52 = vadd.f32 %v2407_v50, %v2406_v34 }
 0x3f5   :  { %v2416_v53 = vadd.f32 %v3806_v51, %v2408_v52 }
 0x3f7   :  { %4221 = vmatmul.mubr.msk.f32.vlgmr.msra.gmra.mrb[40].mxu1 %vm2424_vm3, %v2416_v53 }
 0x3f8   :  { %4431 = vmatpush3.bf16.msra.mxu1 %v5650_v6  ;;  %4242 = vmatprep.mubr.msk.f32.mxu1 %vm4816_vm1, %v4815_v38 }
 0x3f9   :  { %4432 = vmatprep.subr.bf16.mxu1 %v4814_v60 }
 0x3fc   :  { %4434 = vmatpush3.bf16.msra.mxu1 %v5660_v9 }
 0x3fd   :  { %4435 = vmatprep.subr.bf16.mxu1 %v4814_v60 }
 0x4ca   :  { %v2494_v55 = vpop.f32.mrb[40].mxu1 }
 0x4cb   :  { %v2504_v57 = vadd.f32 %v3808_v54, %v2494_v55  ;;  %v4222_v58 = vpop.f32.mrb[41].mxu1 }
 0x4cd   :  { %v2512_v59 = vadd.f32 %v5680_v56, %v2504_v57 }
 0x4cf   :  { %4688 = vtanh.f32 %v2512_v59  ;;  %v3810_v63 = vmul.f32 -1.442695, %v2512_v59 }
 0x4d1   :  { %4690 = vpow2.f32 %v3810_v63 }
 0x4d9   :  { %v4689_v62 = vpop.eup %4688 }
 0x4da   :  { %2522 = vrot.lane.b32.xlu0 %v4689_v62, %s4817_s4 }
 0x4db   :  { %v4691_v0 = vpop.eup %4690 }
 0x4dc   :  { %v2516_v1 = vadd.f32 1.0, %v4691_v0 }
 0x4de   :  { %4692 = vrcp.f32 %v2516_v1 }
 0x4e8   :  { %v4693_v2 = vpop.eup %4692 }
 0x4e9   :  { %v2520_v5 = vmul.f32 0.0, %v4693_v2 }
 0x54c   :  { %v2523_v3 = vpop.permute.xlu0 %2522 }
 0x54d   :  { %v2525_v4 = vmul.f32 %v4693_v2, %v2523_v3 }
 0x54f   :  { %2527 = vrot.lane.b32.xlu0 %v2525_v4, %s4817_s4 }
 0x5c1   :  { %v2528_v7 = vpop.permute.xlu0 %2527 }
 0x5c2   :  { %v5685_v8 = vadd.f32 %v2528_v7, %v2520_v5 }
 0x5c4   :  { %4694 = vtanh.f32 %v5685_v8 }
 0x5ce   :  { %v4695_v16 = vpop.eup %4694 }
 0x5cf   :  { %2533 = vrot.lane.b32.xlu1 %v4695_v16, %s4817_s4 }
 0x641   :  { %v2534_v17 = vpop.permute.xlu1 %2533 }
 0x642   :  { %v2536_v18 = vmul.f32 %v4693_v2, %v2534_v17 }
 0x644   :  { %2549 = vrot.lane.b32.xlu1 %v2536_v18, %s4818_s2 }
 0x6b6   :  { %v2550_v19 = vpop.permute.xlu1 %2549 }
 0x6b7   :  { %4232 = vmatmul.mubr.msk.f32.vlgmr.msra.gmra.mrb[8].mxu0 %vm2424_vm3, %v2550_v19  ;;  %4243 = vmatmul.mubr.msk.f32.vlgmr.msra.gmra.mrb[42].mxu1 %vm2424_vm3, %v2550_v19 }
 0x6b8   :  { %4249 = vmatprep.mubr.msk.f32.mxu1 %vm4816_vm1, %v4815_v38  ;;  %4441 = vmatpush3.bf16.msra.mxu0 %v5697_v13 }
 0x6b9   :  { %4442 = vmatprep.subr.bf16.mxu0 %v4814_v60  ;;  %4260 = vmatprep.mubr.msk.f32.mxu0 %vm4816_vm1, %v4815_v38 }
 0x6ba   :  { %4438 = vmatpush3.bf16.msk.msra.mxu1 %vm5743_vm9, %v5741_v40 }
 0x6bb   :  { %4445 = vmatprep.subr.bf16.mxu1 %v4814_v60 }
 0x6bc   :  { %4444 = vmatpush3.bf16.msra.mxu0 %v5703_v15 }
 0x6bd   :  { %4451 = vmatprep.subr.bf16.mxu0 %v4814_v60 }
 0x78a   :  { %v2619_v21 = vpop.f32.mrb[8].mxu0  ;;  %v2735_v22 = vpop.f32.mrb[42].mxu1 }
 0x78b   :  { %v2620_v23 = vadd.f32 %v5723_v20, %v2619_v21  ;;  %v4233_v24 = vpop.f32.mrb[9].mxu0  ;;  %v4244_v25 = vpop.f32.mrb[43].mxu1 }
 0x78d   :  { %v2624_v26 = vsel %vm2623_vm4, %v2620_v23, -inf }
 0x78e   :  { %2625 = vmax.xlane.f32.xlu0 %v2624_v26 }
 0x81b   :  { %v2626_v28 = vpop.xlane.xlu0 %2625 }
 0x81c   :  { %v5730_v29 = vsub.f32 %v2620_v23, %v2626_v28 }
 0x81e   :  { %vm2635_vm5 = vcmp.eq.f32.partialorder %v5730_v29, 0.0 }
 0x81f   :  { %v2636_v30 = vsel %vm2635_vm5, %v5728_v27, 10  ;;  %vm3239_vm5 = vcmp.eq.s32.totalorder %v5728_v27, 2 }
 0x820   :  { %v2637_v31 = vsel %vm2623_vm4, %v2636_v30, 2147483647 }
 0x821   :  { %v2639_v32 = vshra.s32 %v2637_v31, 16  ;;  %v2638_v34 = vand.u32 65535, %v2637_v31 }
 0x823   :  { %v2641_v33 = vcvt.s32.f32 %v2639_v32  ;;  %v2640_v36 = vcvt.s32.f32 %v2638_v34 }
 0x825   :  { %2642 = vmin.xlane.f32.xlu1 %v2641_v33 }
 0x8b2   :  { %v2643_v35 = vpop.xlane.xlu1 %2642 }
 0x8b3   :  { %vm2644_vm6 = vcmp.eq.f32.partialorder %v2641_v33, %v2643_v35  ;;  %v2649_v42 = vcvt.f32.s32 %v2643_v35 }
 0x8b4   :  { %v2645_v37 = vsel %vm2644_vm6, %v2640_v36, inf }
 0x8b5   :  { %2646 = vmin.xlane.f32.xlu0 %v2645_v37  ;;  %v2650_v44 = vshll.u32 %v2649_v42, 16 }
 0x942   :  { %v2647_v43 = vpop.xlane.xlu0 %2646 }
 0x943   :  { %v2648_v45 = vcvt.f32.s32 %v2647_v43 }
 0x945   :  { %v5751_v46 = vadd.s32 %v2650_v44, %v2648_v45 }
 0x947   :  { %vm2664_vm11 = vcmp.eq.s32.totalorder %v5728_v27, %v5751_v46  ;;  %v2661_v36 = vsel %vm2660_vm14, %v5751_v46, 0 }
 0x948   :  { %v3813_v47 = vsel %vm2664_vm11, 1.0, %v4815_v38 }
 0x949   :  { %4250 = vmatmul.mubr.msk.f32.vlgmr.msra.gmra.mrb[44].mxu1 %vm2739_vm10, %v3813_v47 }
 0x94a   :  { %4447 = vmatpush3.bf16.msra.mxu1 %v5650_v6  ;;  %4271 = vmatprep.mubr.msk.f32.mxu1 %vm4816_vm1, %v4815_v38 }
 0x94b   :  { %4448 = vmatprep.subr.bf16.mxu1 %v4814_v60 }
 0x94e   :  { %4450 = vmatpush3.bf16.msra.mxu1 %v5660_v9 }
 0x94f   :  { %4455 = vmatprep.subr.bf16.mxu1 %v4814_v60 }
 0xa1c   :  { %v2813_v48 = vpop.f32.mrb[44].mxu1 }
 0xa1d   :  { %v2814_v49 = vadd.f32 %v2813_v48, %v2735_v22  ;;  %v4251_v50 = vpop.f32.mrb[45].mxu1 }
 0xa1f   :  { %v2817_v51 = vadd.f32 %v5680_v56, %v2814_v49 }
 0xa21   :  { %4696 = vtanh.f32 %v2817_v51  ;;  %v3817_v53 = vmul.f32 -1.442695, %v2817_v51 }
 0xa23   :  { %4698 = vpow2.f32 %v3817_v53 }
 0xa2b   :  { %v4697_v52 = vpop.eup %4696 }
 0xa2c   :  { %2827 = vrot.lane.b32.xlu0 %v4697_v52, %s4817_s4 }
 0xa2d   :  { %v4699_v54 = vpop.eup %4698 }
 0xa2e   :  { %v2821_v55 = vadd.f32 1.0, %v4699_v54 }
 0xa30   :  { %4700 = vrcp.f32 %v2821_v55 }
 0xa3a   :  { %v4701_v57 = vpop.eup %4700 }
 0xa3b   :  { %v2825_v62 = vmul.f32 %v4701_v57, %v5685_v8 }
 0xa9e   :  { %v2828_v58 = vpop.permute.xlu0 %2827 }
 0xa9f   :  { %v2830_v59 = vmul.f32 %v4701_v57, %v2828_v58 }
 0xaa1   :  { %2832 = vrot.lane.b32.xlu1 %v2830_v59, %s4817_s4 }
 0xb13   :  { %v2833_v63 = vpop.permute.xlu1 %2832 }
 0xb14   :  { %v5767_v0 = vadd.f32 %v2833_v63, %v2825_v62 }
 0xb16   :  { %4702 = vtanh.f32 %v5767_v0 }
 0xb20   :  { %v4703_v1 = vpop.eup %4702 }
 0xb21   :  { %2838 = vrot.lane.b32.xlu1 %v4703_v1, %s4817_s4 }
 0xb93   :  { %v2839_v2 = vpop.permute.xlu1 %2838 }
 0xb94   :  { %v2841_v3 = vmul.f32 %v4701_v57, %v2839_v2 }
 0xb96   :  { %2843 = vrot.lane.b32.xlu0 %v2841_v3, %s4818_s2 }
 0xc08   :  { %v2844_v4 = vpop.permute.xlu0 %2843 }
 0xc09   :  { %4261 = vmatmul.mubr.msk.f32.vlgmr.msra.gmra.mrb[10].mxu0 %vm2424_vm3, %v2844_v4  ;;  %4272 = vmatmul.mubr.msk.f32.vlgmr.msra.gmra.mrb[46].mxu1 %vm2424_vm3, %v2844_v4 }
 0xc0a   :  { %4454 = vmatpush3.bf16.msk.msra.mxu0 %vm5743_vm9, %v5741_v40  ;;  %4278 = vmatprep.mubr.msk.f32.mxu0 %vm4816_vm1, %v4815_v38 }
 0xc0b   :  { %4461 = vmatprep.subr.bf16.mxu0 %v4814_v60  ;;  %4457 = vmatpush3.bf16.msra.mxu1 %v5697_v13 }
 0xc0c   :  { %4458 = vmatprep.subr.bf16.mxu1 %v4814_v60  ;;  %4289 = vmatprep.mubr.msk.f32.mxu1 %vm4816_vm1, %v4815_v38 }
 0xc0f   :  { %4460 = vmatpush3.bf16.msra.mxu1 %v5703_v15 }
 0xc10   :  { %4467 = vmatprep.subr.bf16.mxu1 %v4814_v60 }
 0xcdc   :  { %v2913_v5 = vpop.f32.mrb[10].mxu0  ;;  %v3026_v7 = vpop.f32.mrb[46].mxu1 }
 0xcdd   :  { %v2914_v8 = vadd.f32 %v5723_v20, %v2913_v5  ;;  %v4262_v10 = vpop.f32.mrb[11].mxu0  ;;  %v4273_v11 = vpop.f32.mrb[47].mxu1 }
 0xcdf   :  { %v2917_v12 = vsel %vm2623_vm4, %v2914_v8, -inf }
 0xce0   :  { %2918 = vmax.xlane.f32.xlu1 %v2917_v12 }
 0xd6d   :  { %v2919_v14 = vpop.xlane.xlu1 %2918 }
 0xd6e   :  { %v2920_v16 = vsub.f32 %v2914_v8, %v2919_v14 }
 0xd70   :  { %v2921_v17 = vmul.f32 1.442695, %v2920_v16  ;;  %vm2928_vm12 = vcmp.eq.f32.partialorder %v2920_v16, 0.0 }
 0xd71   :  { %v2929_v18 = vsel %vm2928_vm12, %v5728_v27, 10 }
 0xd72   :  { %4704 = vpow2.f32 %v2921_v17  ;;  %v2930_v19 = vsel %vm2623_vm4, %v2929_v18, 2147483647 }
 0xd73   :  { %v2932_v21 = vshra.s32 %v2930_v19, 16  ;;  %v2931_v25 = vand.u32 65535, %v2930_v19 }
 0xd75   :  { %v2934_v22 = vcvt.s32.f32 %v2932_v21  ;;  %v2933_v28 = vcvt.s32.f32 %v2931_v25 }
 0xd77   :  { %2935 = vmin.xlane.f32.xlu0 %v2934_v22 }
 0xd7c   :  { %v5790_v23 = vpop.eup %4704 }
 0xd7d   :  { %v5793_v24 = vmul.f32 %v5790_v23, %v2920_v16 }
 0xe04   :  { %v2936_v26 = vpop.xlane.xlu0 %2935 }
 0xe05   :  { %vm2937_vm13 = vcmp.eq.f32.partialorder %v2934_v22, %v2936_v26  ;;  %v2942_v31 = vcvt.f32.s32 %v2936_v26 }
 0xe06   :  { %v2938_v30 = vsel %vm2937_vm13, %v2933_v28, inf }
 0xe07   :  { %2939 = vmin.xlane.f32.xlu0 %v2938_v30  ;;  %v2943_v33 = vshll.u32 %v2942_v31, 16 }
 0xe94   :  { %v2940_v32 = vpop.xlane.xlu0 %2939 }
 0xe95   :  { %v2941_v34 = vcvt.f32.s32 %v2940_v32 }
 0xe97   :  { %v2944_v35 = vadd.s32 %v2943_v33, %v2941_v34 }
 0xe99   :  { %vm2957_vm0 = vcmp.eq.s32.totalorder %v5728_v27, %v2944_v35  ;;  %v5803_v37 = vsel %vm2953_vm15, %v2944_v35, %v2661_v36 }
 0xe9a   :  { %v3819_v61 = vsel %vm2957_vm0, 1.0, %v4815_v38 }
 0xe9b   :  { %4279 = vmatmul.mubr.msk.f32.vlgmr.msra.gmra.mrb[12].mxu0 %vm2739_vm10, %v3819_v61 }
 0xe9c   :  { %4463 = vmatpush3.bf16.msra.mxu0 %v5650_v6  ;;  %4300 = vmatprep.mubr.msk.f32.mxu0 %vm4816_vm1, %v4815_v38 }
 0xe9d   :  { %4464 = vmatprep.subr.bf16.mxu0 %v4814_v60 }
 0xea0   :  { %4466 = vmatpush3.bf16.msra.mxu0 %v5660_v9 }
 0xea1   :  { %4471 = vmatprep.subr.bf16.mxu0 %v4814_v60 }
 0xf6e   :  { %v3099_v39 = vpop.f32.mrb[12].mxu0 }
 0xf6f   :  { %v3100_v42 = vadd.f32 %v3099_v39, %v3026_v7  ;;  %v4280_v43 = vpop.f32.mrb[13].mxu0 }
 0xf71   :  { %v3103_v44 = vadd.f32 %v5680_v56, %v3100_v42 }
 0xf73   :  { %4706 = vtanh.f32 %v3103_v44  ;;  %v3823_v46 = vmul.f32 -1.442695, %v3103_v44 }
 0xf75   :  { %4708 = vpow2.f32 %v3823_v46  ;;  %v2628_v46 = vmul.f32 1.442695, %v5730_v29 }
 0xf7d   :  { %v4707_v45 = vpop.eup %4706 }
 0xf7e   :  { %3113 = vrot.lane.b32.xlu1 %v4707_v45, %s4817_s4  ;;  %v2923_v45 = vsel %vm2623_vm4, %v5790_v23, 0.0 }
 0xf7f   :  { %v4709_v6 = vpop.eup %4708 }
 0xf80   :  { %v3107_v47 = vadd.f32 1.0, %v4709_v6 }
 0xf82   :  { %4710 = vrcp.f32 %v3107_v47 }
 0xf8c   :  { %v4711_v48 = vpop.eup %4710 }
 0xf8d   :  { %v3111_v9 = vmul.f32 %v4711_v48, %v5767_v0 }
 0xff0   :  { %v3114_v49 = vpop.permute.xlu1 %3113 }
 0xff1   :  { %v3116_v50 = vmul.f32 %v4711_v48, %v3114_v49 }
 0xff3   :  { %3118 = vrot.lane.b32.xlu0 %v3116_v50, %s4817_s4 }
0x1065   :  { %v3119_v51 = vpop.permute.xlu0 %3118 }
0x1066   :  { %v5817_v52 = vadd.f32 %v3119_v51, %v3111_v9 }
0x1068   :  { %4712 = vtanh.f32 %v5817_v52 }
0x1072   :  { %v4713_v53 = vpop.eup %4712 }
0x1073   :  { %3124 = vrot.lane.b32.xlu1 %v4713_v53, %s4817_s4 }
0x10e5   :  { %v3125_v54 = vpop.permute.xlu1 %3124 }
0x10e6   :  { %v3127_v55 = vmul.f32 %v4711_v48, %v3125_v54 }
0x10e8   :  { %3129 = vrot.lane.b32.xlu1 %v3127_v55, %s4818_s2 }
0x115a   :  { %v3130_v57 = vpop.permute.xlu1 %3129 }
0x115b   :  { %4290 = vmatmul.mubr.msk.f32.vlgmr.msra.gmra.mrb[48].mxu1 %vm2424_vm3, %v3130_v57  ;;  %4301 = vmatmul.mubr.msk.f32.vlgmr.msra.gmra.mrb[14].mxu0 %vm2424_vm3, %v3130_v57 }
0x115c   :  { %4470 = vmatpush3.bf16.msk.msra.mxu1 %vm5743_vm9, %v5741_v40  ;;  %4307 = vmatprep.mubr.msk.f32.mxu1 %vm4816_vm1, %v4815_v38 }
0x115d   :  { %4473 = vmatpush3.bf16.msra.mxu0 %v5697_v13  ;;  %4318 = vmatprep.mubr.msk.f32.mxu0 %vm4816_vm1, %v4815_v38 }
0x115e   :  { %4474 = vmatprep.subr.bf16.mxu0 %v4814_v60 }
0x1161   :  { %4476 = vmatpush3.bf16.msra.mxu0 %v5703_v15 }
0x122e   :  { %v3199_v58 = vpop.f32.mrb[48].mxu1  ;;  %v3312_v59 = vpop.f32.mrb[14].mxu0 }
0x122f   :  { %v3200_v62 = vadd.f32 %v5723_v20, %v3199_v58  ;;  %v4291_v63 = vpop.f32.mrb[49].mxu1  ;;  %v4302_v0 = vpop.f32.mrb[15].mxu0 }
0x1231   :  { %v3203_v40 = vsel %vm2623_vm4, %v3200_v62, -inf }
0x1232   :  { %3204 = vmax.xlane.f32.xlu0 %v3203_v40 }
0x12bf   :  { %v3205_v41 = vpop.xlane.xlu0 %3204 }
0x12c0   :  { %v5836_v1 = vsub.f32 %v3200_v62, %v3205_v41 }
0x12c2   :  { %vm3214_vm2 = vcmp.eq.f32.partialorder %v5836_v1, 0.0  ;;  %v3207_v6 = vmul.f32 1.442695, %v5836_v1 }
0x12c3   :  { %v3215_v13 = vsel %vm3214_vm2, %v5728_v27, 10 }
0x12c4   :  { %v3216_v60 = vsel %vm2623_vm4, %v3215_v13, 2147483647 }
0x12c5   :  { %v3218_v2 = vshra.s32 %v3216_v60, 16  ;;  %v3217_v3 = vand.u32 65535, %v3216_v60 }
0x12c7   :  { %v3220_v15 = vcvt.s32.f32 %v3218_v2  ;;  %v3219_v5 = vcvt.s32.f32 %v3217_v3 }
0x12c9   :  { %3221 = vmin.xlane.f32.xlu1 %v3220_v15 }
0x1356   :  { %v3222_v4 = vpop.xlane.xlu1 %3221 }
0x1357   :  { %vm3223_vm1 = vcmp.eq.f32.partialorder %v3220_v15, %v3222_v4  ;;  %v3228_v8 = vcvt.f32.s32 %v3222_v4 }
0x1358   :  { %v3224_v7 = vsel %vm3223_vm1, %v3219_v5, inf }
0x1359   :  { %3225 = vmin.xlane.f32.xlu0 %v3224_v7  ;;  %v3229_v11 = vshll.u32 %v3228_v8, 16 }
0x13e6   :  { %v3226_v10 = vpop.xlane.xlu0 %3225 }
0x13e7   :  { %v3227_v12 = vcvt.f32.s32 %v3226_v10 }
0x13e9   :  { %v3230_v14 = vadd.s32 %v3229_v11, %v3227_v12 }
0x13eb   :  { %vm3243_vm6 = vcmp.eq.s32.totalorder %v5728_v27, %v3230_v14  ;;  %v5846_v16 = vsel %vm3239_vm5, %v3230_v14, %v5803_v37 }
0x13ec   :  { %v3825_v17 = vsel %vm3243_vm6, 1.0, %v4815_v38 }
0x13ed   :  { %4308 = vmatmul.mubr.msk.f32.vlgmr.msra.gmra.mrb[50].mxu1 %vm2739_vm10, %v3825_v17 }
0x14c0   :  { %v3385_v18 = vpop.f32.mrb[50].mxu1 }
0x14c1   :  { %v3386_v19 = vadd.f32 %v3385_v18, %v3312_v59  ;;  %v4309_v21 = vpop.f32.mrb[51].mxu1  ;;  %v2946_v59 = vsel %vm2623_vm4, %v5793_v24, 0.0 }
0x14c3   :  { %v3389_v22 = vadd.f32 %v5680_v56, %v3386_v19 }
0x14c5   :  { %4714 = vtanh.f32 %v3389_v22  ;;  %v3829_v26 = vmul.f32 -1.442695, %v3389_v22 }
0x14c7   :  { %4716 = vpow2.f32 %v3829_v26 }
0x14cf   :  { %v4715_v25 = vpop.eup %4714 }
0x14d0   :  { %3399 = vrot.lane.b32.xlu0 %v4715_v25, %s4817_s4 }
0x14d1   :  { %v4717_v28 = vpop.eup %4716 }
0x14d2   :  { %v3393_v30 = vadd.f32 1.0, %v4717_v28 }
0x14d4   :  { %4718 = vrcp.f32 %v3393_v30 }
0x14de   :  { %v4719_v31 = vpop.eup %4718 }
0x14df   :  { %v3397_v38 = vmul.f32 %v4719_v31, %v5817_v52 }
0x1542   :  { %v3400_v32 = vpop.permute.xlu0 %3399 }
0x1543   :  { %v3402_v33 = vmul.f32 %v4719_v31, %v3400_v32 }
0x1545   :  { %3404 = vrot.lane.b32.xlu1 %v3402_v33, %s4817_s4 }
0x15b7   :  { %v3405_v34 = vpop.permute.xlu1 %3404 }
0x15b8   :  { %v3407_v35 = vadd.f32 %v3405_v34, %v3397_v38 }
0x15ba   :  { %4720 = vtanh.f32 %v3407_v35 }
0x15bb   :  { %4722 = vpow2.f32 %v2628_v46 }
0x15bc   :  { %4724 = vpow2.f32 %v3207_v6 }
0x15c4   :  { %v4721_v56 = vpop.eup %4720 }
0x15c5   :  { %3410 = vrot.lane.b32.xlu1 %v4721_v56, %s4817_s4  ;;  %v4723_v52 = vpop.eup %4722 }
0x15c6   :  { %v2630_v23 = vsel %vm2623_vm4, %v4723_v52, 0.0  ;;  %v4725_v53 = vpop.eup %4724  ;;  %v2652_v58 = vmul.f32 %v4723_v52, %v5730_v29 }
0x15c7   :  { %v3209_v57 = vsel %vm2623_vm4, %v4725_v53, 0.0  ;;  %v3231_v63 = vmul.f32 %v4725_v53, %v5836_v1 }
0x15c8   :  { %v2653_v62 = vsel %vm2623_vm4, %v2652_v58, 0.0 }
0x15c9   :  { %v3232_v0 = vsel %vm2623_vm4, %v3231_v63, 0.0 }
0x1637   :  { %v3411_v36 = vpop.permute.xlu1 %3410 }
0x1638   :  { %v3413_v37 = vmul.f32 %v4719_v31, %v3411_v36 }
0x163a   :  { %3415 = vrot.lane.b32.xlu0 %v3413_v37, %s4818_s2 }
0x16ac   :  { %v3416_v61 = vpop.permute.xlu0 %3415 }
0x16ad   :  { %4319 = vmatmul.mubr.msk.f32.vlgmr.msra.gmra.mrb[16].mxu0 %vm2424_vm3, %v3416_v61 }
0x1780   :  { %v3485_v39 = vpop.f32.mrb[16].mxu0 }
0x1781   :  { %v3486_v42 = vadd.f32 %v5723_v20, %v3485_v39  ;;  %v4320_v43 = vpop.f32.mrb[17].mxu0 }
0x1783   :  { %v3489_v44 = vsel %vm2623_vm4, %v3486_v42, -inf }
0x1784   :  { %3490 = vmax.xlane.f32.xlu1 %v3489_v44 }
0x1788   :  { %2924 = vadd.xlane.f32.xlu1 %v2923_v45 }
0x1811   :  { %v3491_v47 = vpop.xlane.xlu1 %3490 }
0x1812   :  { %v3492_v48 = vsub.f32 %v3486_v42, %v3491_v47 }
0x1814   :  { %v3493_v49 = vmul.f32 1.442695, %v3492_v48  ;;  %vm3500_vm3 = vcmp.eq.f32.partialorder %v3492_v48, 0.0 }
0x1815   :  { %v3501_v20 = vsel %vm3500_vm3, %v5728_v27, 10  ;;  %v2925_v2 = vpop.xlane.xlu1 %2924 }
0x1816   :  { %4726 = vpow2.f32 %v3493_v49  ;;  %v3502_v50 = vsel %vm2623_vm4, %v3501_v20, 2147483647 }
0x1817   :  { %v3504_v9 = vshra.s32 %v3502_v50, 16  ;;  %v3503_v13 = vand.u32 65535, %v3502_v50  ;;  %4728 = vlog2.f32 %v2925_v2 }
0x1819   :  { %v3506_v51 = vcvt.s32.f32 %v3504_v9  ;;  %v3505_v29 = vcvt.s32.f32 %v3503_v13 }
0x181b   :  { %3507 = vmin.xlane.f32.xlu0 %v3506_v51 }
0x181f   :  { %2631 = vadd.xlane.f32.xlu0 %v2630_v23 }
0x1820   :  { %v4727_v54 = vpop.eup %4726 }
0x1821   :  { %v3495_v55 = vsel %vm2623_vm4, %v4727_v54, 0.0  ;;  %v3517_v40 = vmul.f32 %v4727_v54, %v3492_v48  ;;  %v4729_v5 = vpop.eup %4728 }
0x1822   :  { %3496 = vadd.xlane.f32.xlu1 %v3495_v55  ;;  %v2927_v19 = vmul.f32 0.6931472, %v4729_v5 }
0x1823   :  { %3210 = vadd.xlane.f32.xlu0 %v3209_v57  ;;  %v3518_v41 = vsel %vm2623_vm4, %v3517_v40, 0.0  ;;  %vm3525_vm4 = vcmp.eq.s32.totalorder %v5728_v27, 3 }
0x1824   :  { %v2952_v35 = vsub.f32 0.0, %v2927_v19 }
0x1826   :  { %2947 = vadd.xlane.f32.xlu1 %v2946_v59 }
0x1827   :  { %2654 = vadd.xlane.f32.xlu0 %v2653_v62 }
0x182b   :  { %3233 = vadd.xlane.f32.xlu0 %v3232_v0 }
0x182f   :  { %3519 = vadd.xlane.f32.xlu0 %v3518_v41 }
0x18a8   :  { %v5875_v60 = vpop.xlane.xlu0 %3507 }
0x18a9   :  { %vm3509_vm7 = vcmp.eq.f32.partialorder %v3506_v51, %v5875_v60 }
0x18aa   :  { %v3510_v24 = vsel %vm3509_vm7, %v3505_v29, inf }
0x18ab   :  { %3511 = vmin.xlane.f32.xlu1 %v3510_v24 }
0x18ac   :  { %v2632_v15 = vpop.xlane.xlu0 %2631 }
0x18ad   :  { %4730 = vlog2.f32 %v2632_v15 }
0x18ae   :  { %4732 = vrcp.f32 %v2632_v15 }
0x18af   :  { %4734 = vrcp.f32 %v2925_v2  ;;  %v3497_v1 = vpop.xlane.xlu1 %3496 }
0x18b0   :  { %4736 = vlog2.f32 %v3497_v1  ;;  %v3211_v3 = vpop.xlane.xlu0 %3210 }
0x18b1   :  { %4738 = vrcp.f32 %v3497_v1 }
0x18b2   :  { %4740 = vlog2.f32 %v3211_v3 }
0x18b3   :  { %4742 = vrcp.f32 %v3211_v3  ;;  %v2948_v10 = vpop.xlane.xlu1 %2947 }
0x18b4   :  { %v2655_v4 = vpop.xlane.xlu0 %2654 }
0x18b7   :  { %v4731_v7 = vpop.eup %4730 }
0x18b8   :  { %v4733_v8 = vpop.eup %4732  ;;  %v2634_v11 = vmul.f32 0.6931472, %v4731_v7  ;;  %v3234_v12 = vpop.xlane.xlu0 %3233 }
0x18b9   :  { %v4735_v14 = vpop.eup %4734  ;;  %v2657_v17 = vmul.f32 %v4733_v8, %v2655_v4 }
0x18ba   :  { %v4737_v18 = vpop.eup %4736  ;;  %v2659_v21 = vsub.f32 0.0, %v2634_v11  ;;  %v2950_v25 = vmul.f32 %v4735_v14, %v2948_v10 }
0x18bb   :  { %v4739_v22 = vpop.eup %4738  ;;  %v2658_v26 = vsub.f32 %v2634_v11, %v2657_v17  ;;  %v3499_v31 = vmul.f32 0.6931472, %v4737_v18 }
0x18bc   :  { %v4741_v28 = vpop.eup %4740  ;;  %v3520_v30 = vpop.xlane.xlu0 %3519  ;;  %v2662_v33 = vsel %vm2660_vm14, %v2659_v21, 0.0  ;;  %v2951_v37 = vsub.f32 %v2927_v19, %v2950_v25 }
0x18bd   :  { %v4743_v32 = vpop.eup %4742  ;;  %v3213_v38 = vmul.f32 0.6931472, %v4741_v28  ;;  %v3522_v34 = vmul.f32 %v4739_v22, %v3520_v30  ;;  %v2663_v56 = vsel %vm2660_vm14, %v2658_v26, 0.0  ;;  %v3524_v43 = vsub.f32 0.0, %v3499_v31 }
0x18be   :  { %v3236_v36 = vmul.f32 %v4743_v32, %v3234_v12  ;;  %v2955_v44 = vsel %vm2953_vm15, %v2952_v35, %v2662_v33  ;;  %v2956_v45 = vsel %vm2953_vm15, %v2951_v37, %v2663_v56 }
0x18bf   :  { %v3238_v61 = vsub.f32 0.0, %v3213_v38  ;;  %v3523_v39 = vsub.f32 %v3499_v31, %v3522_v34 }
0x18c0   :  { %v3237_v42 = vsub.f32 %v3213_v38, %v3236_v36 }
0x18c1   :  { %v3241_v46 = vsel %vm3239_vm5, %v3238_v61, %v2955_v44 }
0x18c2   :  { %v3527_v6 = vsel %vm3525_vm4, %v3524_v43, %v3241_v46  ;;  %v3242_v47 = vsel %vm3239_vm5, %v3237_v42, %v2956_v45 }
0x18c3   :  { %3531 = vst.msk [vmem:[#allocation5] sm:$0x3] %vm3529_vm8, %v3527_v6  ;;  %v3528_v48 = vsel %vm3525_vm4, %v3523_v39, %v3242_v47 }
0x18c4   :  { %4755 = shalt.err (!%p4752_p4)
}
0x18c5   :  { %s4756_s1 = scalar_lea.hbm %s5959_s14, 32 }
0x18c6   :  { %p4757_p5 = scmp.ne.s32.totalorder %s5959_s14, %s4756_s1  ;;  %p4760_p6 = scmp.lt.u32.totalorder %s4756_s1, %s5959_s14 }
0x18c8   :  { %p4762_p7 = pnand %p4760_p6, %p4757_p5 }
0x18ca   :  { %4765 = shalt.err (!%p4762_p7)
}
0x18cb   :  { %3552 = dma.vmem_to_hbm [thread:$0]  %s3550_s28, 32, %s5959_s14, [#allocation6]   ;;  %3532 = vst.msk [vmem:[#allocation7] sm:$0x3] %vm3529_vm8, %v3528_v48 }
0x18cc   :  { %s4766_s10 = scalar_lea.vmem %s5893_s30, 32  ;;  %p4771_p9 = scmp.lt.s32.totalorder %s5893_s30, %s5893_s30 }
0x18cd   :  { %p4767_p8 = scmp.ne.s32.totalorder %s5893_s30, %s4766_s10  ;;  %p4772_p10 = scmp.lt.s32.totalorder %s4766_s10, %s4766_s10 }
0x18cf   :  { %p4773_p11 = por %p4772_p10, %p4771_p9 }
0x18d1   :  { %p4774_p12 = pnand %p4773_p11, %p4767_p8 }
0x18d3   :  { %4777 = shalt.err (!%p4774_p12)
}
0x18d4   :  { %s4778_s0 = scalar_lea.hbm %s5960_s15, 32 }
0x18d5   :  { %p4779_p13 = scmp.ne.s32.totalorder %s5960_s15, %s4778_s0  ;;  %p4782_p0 = scmp.lt.u32.totalorder %s4778_s0, %s5960_s15 }
0x18d7   :  { %p4784_p1 = pnand %p4782_p0, %p4779_p13 }
0x18d9   :  { %4787 = shalt.err (!%p4784_p1)
}
0x18da   :  { %3562 = dma.vmem_to_hbm [thread:$0]  %s5893_s30, 32, %s5960_s15, [#allocation6]   ;;  %v3514_v49 = vcvt.f32.s32 %v5875_v60 }
0x18db   :  { %s4822_s3 = smov [#allocation3]  }
0x18dc   :  { %v3515_v50 = vshll.u32 %v3514_v49, 16  ;;  %s3539_s12 = sshll.u32 %s4822_s3, 4  ;;  %s3540_s12 = int_to_ptr.vmem [resolvable:$true] %s3539_s12 }
0x18dd   :  { %s4788_s26 = scalar_lea.vmem %s3540_s12, 32  ;;  %p4793_p3 = scmp.lt.s32.totalorder %s3540_s12, %s3540_s12 }
0x18de   :  { %p4789_p2 = scmp.ne.s32.totalorder %s3540_s12, %s4788_s26  ;;  %p4794_p4 = scmp.lt.s32.totalorder %s4788_s26, %s4788_s26 }
0x18e0   :  { %p4795_p5 = por %p4794_p4, %p4793_p3 }
0x18e2   :  { %p4796_p6 = pnand %p4795_p5, %p4789_p2 }
0x1938   :  { %v3512_v20 = vpop.xlane.xlu1 %3511 }
0x1939   :  { %v3513_v9 = vcvt.f32.s32 %v3512_v20 }
0x193b   :  { %v3516_v51 = vadd.s32 %v3515_v50, %v3513_v9 }
0x193d   :  { %v3526_v52 = vsel %vm3525_vm4, %v3516_v51, %v5846_v16 }
0x193e   :  { %3530 = vst.msk [vmem:[#allocation3] sm:$0x3] %vm3529_vm8, %v3526_v52 }
0x193f   :  { %4799 = shalt.err (!%p4796_p6)
}
0x1940   :  { %s4800_s5 = scalar_lea.hbm %s5958_s13, 32 }
0x1941   :  { %p4801_p7 = scmp.ne.s32.totalorder %s5958_s13, %s4800_s5  ;;  %p4804_p8 = scmp.lt.u32.totalorder %s4800_s5, %s5958_s13 }
0x1943   :  { %p4806_p9 = pnand %p4804_p8, %p4801_p7 }
0x1945   :  { %4809 = shalt.err (!%p4806_p9)
}
0x1946   :  { %3542 = dma.vmem_to_hbm [thread:$0]  %s3540_s12, 32, %s5958_s13, [#allocation4]  }
0x1947   :  { %4810 = dma.done.wait [#allocation4], 32  }
0x1948   :  { %4811 = vsyncadd [#allocation4], 4294967264 }
0x1949   :  { %4812 = dma.done.wait [#allocation6], 64  }
0x194a   :  { %4813 = vsyncadd [#allocation6], 4294967232 }
0x194b   :  { %3572 = vsyncpa [#allocation4], 1 }
0x194c   :  { %3573 = vsyncpa [#allocation6], 1 }

</bundles_post_ra>
